<compile_context>
chip_gen: v7x
topology: tpu7x:2x2x1
jax: 0.10.0
libtpu: 0.0.40
codegen_flags: <defaults>
</compile_context>

<pallas_src>
from functools import partial

import jax
import jax.numpy as jnp
from jax import lax
from jax.experimental import pallas as pl
from jax.experimental.pallas import tpu as pltpu


def _vmem_limit_bytes():
    """Generation-aware scoped-VMEM limit."""
    try:
        cap = getattr(pltpu.get_tpu_info(), "vmem_capacity_bytes", None)
    except Exception:
        cap = None
    if cap and cap >= 100 * 1024 * 1024:          # v5e / v6e: 128 MiB parts
        return 112 * 1024 * 1024
    return 48 * 1024 * 1024                        # v7x: 64 MiB physical VMEM


_VMEM_LIMIT = _vmem_limit_bytes()


def _round_up(v, m):
    return ((v + m - 1) // m) * m


def _const_map(nd):
    """Grid-invariant index map (weights are DMA'd once, not per grid step)."""
    return lambda *_: (0,) * nd


# --------------------------- tiled matmul + bias -----------------------------

def _matmul_bias_kernel(x_ref, w_ref, b_ref, o_ref, acc_ref):
    k = pl.program_id(2)

    @pl.when(k == 0)
    def _():
        acc_ref[...] = jnp.zeros_like(acc_ref)

    acc_ref[...] += jnp.dot(x_ref[...], w_ref[...],
                            preferred_element_type=jnp.float32)

    @pl.when(k == pl.num_programs(2) - 1)
    def _():
        o_ref[...] = (acc_ref[...] + b_ref[...]).astype(o_ref.dtype)


def _pick_row_tile(M, cap=512):
    """Row tile that divides M (no activation pad / output slice) when possible."""
    if M <= cap:
        return M, M
    for t in range(cap, 7, -8):                    # largest divisor, multiple of 8
        if M % t == 0:
            return t, M
    return cap, _round_up(M, cap)                  # rare fallback: pad rows


def matmul_bias(x2d, w2d, bias, out_dtype=jnp.bfloat16):
    """o = x @ w + b, tiled over (M, N, K) with f32 accumulation on the MXU."""
    M, K = x2d.shape
    N = w2d.shape[1]

    tm, Mp = _pick_row_tile(M)
    Np = 128 if N < 128 else N                     # lane-dense output stores
    if Np <= 512:
        tn = Np
    elif Np % 256 == 0:
        tn = 256
    elif Np % 128 == 0:
        tn = 128
    else:
        tn = Np
    if K <= 1024:
        tk, Kp = K, K
    elif K % 512 == 0:
        tk, Kp = 512, K
    elif K % 256 == 0:
        tk, Kp = 256, K
    else:
        tk, Kp = K, K

    xp = x2d if (Mp == M and Kp == K) else jnp.pad(x2d, ((0, Mp - M), (0, Kp - K)))
    wp = w2d if (Kp == K and Np == N) else jnp.pad(w2d, ((0, Kp - K), (0, Np - N)))
    bp = (bias if Np == N else jnp.pad(bias, (0, Np - N))).reshape(1, Np)

    out = pl.pallas_call(
        _matmul_bias_kernel,
        out_shape=jax.ShapeDtypeStruct((Mp, Np), out_dtype),
        grid=(Mp // tm, Np // tn, Kp // tk),
        in_specs=[
            pl.BlockSpec((tm, tk), lambda i, j, k: (i, k)),
            pl.BlockSpec((tk, tn), lambda i, j, k: (k, j)),
            pl.BlockSpec((1, tn), lambda i, j, k: (0, j)),
        ],
        out_specs=pl.BlockSpec((tm, tn), lambda i, j, k: (i, j)),
        scratch_shapes=[pltpu.VMEM((tm, tn), jnp.float32)],
        compiler_params=pltpu.CompilerParams(
            dimension_semantics=("parallel", "parallel", "arbitrary"),
            vmem_limit_bytes=_VMEM_LIMIT),
    )(xp, wp, bp)

    if Mp != M or Np != N:
        out = out[:M, :N]
    return out


# --------------------------- PolyBlock kernel --------------------------------

def _polyblock_kernel(x_ref,
                      ln_w_ref, ln_b_ref,
                      w11_ref, w12_ref, ws_ref, w13_ref, b13_ref,
                      w21_ref, w22_ref, w23_ref, b23_ref,
                      o_ref):
    """One PolyBlock for one batch item (rows = padded token count Pp).

       x: (Pp, C) tokens.  ws: (Pp, Pp) spatial (token) mixing matrix.
       z = LayerNorm(x); z = PolyMlp_spatial(z); x = x + z
       z = LayerNorm(x); z = PolyMlp_channel(z); x = x + z
       (the reference PolyBlock applies the SAME self.norm both times)
    """
    x = x_ref[0].astype(jnp.float32)                       # (Pp, C)
    rows, C = x.shape
    ln_w = jnp.broadcast_to(ln_w_ref[...], (rows, C))      # hoisted, done once
    ln_b = jnp.broadcast_to(ln_b_ref[...], (rows, C))
    b13 = b13_ref[...]
    b23 = b23_ref[...]

    def layer_norm(v):                                     # eps = 1e-6
        mu = jnp.mean(v, axis=-1, keepdims=True)
        var = jnp.mean(v * v, axis=-1, keepdims=True) - mu * mu
        var = jnp.maximum(var, 0.0)                        # guard f32 round-off
        return (v - mu) * lax.rsqrt(var + 1e-6) * ln_w + ln_b

    # ---- mlp1: spatial PolyMlp (degree-2 multilinear, token mixing) ----
    zb = layer_norm(x).astype(jnp.bfloat16)
    x1 = jnp.dot(zb, w11_ref[...], preferred_element_type=jnp.float32)
    x2 = jnp.dot(zb, w12_ref[...], preferred_element_type=jnp.float32)
    x2 = jnp.dot(ws_ref[...], x2.astype(jnp.bfloat16),
                 preferred_element_type=jnp.float32)       # token mixing
    h = (x1 * x2).astype(jnp.bfloat16)
    x = x + jnp.dot(h, w13_ref[...], preferred_element_type=jnp.float32) + b13

    # ---- mlp2: channel PolyMlp (expansion_factor hidden width) ----
    # TODO(synk): at real shapes tile this branch over row chunks to cap
    # live f32 temporaries (no cross-row coupling here).
    zb = layer_norm(x).astype(jnp.bfloat16)
    y1 = jnp.dot(zb, w21_ref[...], preferred_element_type=jnp.float32)
    y2 = jnp.dot(zb, w22_ref[...], preferred_element_type=jnp.float32)
    h = (y1 * y2).astype(jnp.bfloat16)
    x = x + jnp.dot(h, w23_ref[...], preferred_element_type=jnp.float32) + b23

    o_ref[0] = x.astype(o_ref.dtype)


def polyblock_apply(x_bhwc, p):
    B, H, W, C = x_bhwc.shape
    P = H * W
    Pp = _round_up(P, 8)                                   # layout-legal token axis

    x3 = x_bhwc.reshape(B, P, C)
    if Pp != P:
        x3 = jnp.pad(x3, ((0, 0), (0, Pp - P), (0, 0)))
    x3 = x3.astype(jnp.bfloat16)

    ws = p['m1_ws']
    if Pp != P:
        ws = jnp.pad(ws, ((0, Pp - P), (0, Pp - P)))       # zero cols keep pad rows inert

    weights = (p['ln_w'], p['ln_b'],
               p['m1_w1'], p['m1_w2'], ws, p['m1_w3'], p['m1_b3'],
               p['m2_w1'], p['m2_w2'], p['m2_w3'], p['m2_b3'])

    out = pl.pallas_call(
        _polyblock_kernel,
        out_shape=jax.ShapeDtypeStruct((B, Pp, C), jnp.bfloat16),
        grid=(B,),
        in_specs=[pl.BlockSpec((1, Pp, C), lambda b: (b, 0, 0))]
                 + [pl.BlockSpec(w.shape, _const_map(w.ndim)) for w in weights],
        out_specs=pl.BlockSpec((1, Pp, C), lambda b: (b, 0, 0)),
        compiler_params=pltpu.CompilerParams(
            dimension_semantics=("parallel",),
            vmem_limit_bytes=_VMEM_LIMIT),
    )(x3, *weights)

    if Pp != P:
        out = out[:, :P, :]
    return out.reshape(B, H, W, C)


# --------------------------- patch-embed conv (k == stride) ------------------

def _space_to_depth(x, k):
    """Non-overlapping kxk patches (kernel == stride): pure reshape, no im2col."""
    B, H, W, C = x.shape
    oh, ow = H // k, W // k
    x = x.reshape(B, oh, k, ow, k, C)
    x = jnp.transpose(x, (0, 1, 3, 2, 4, 5))               # (B, oh, ow, kh, kw, C)
    return x.reshape(B, oh, ow, k * k * C), oh, ow


def conv2d_patch(x_nhwc, w_oihw, bias):
    """Conv2d with kernel == stride (patch embedding) as one tiled matmul."""
    O, I, k, _ = w_oihw.shape
    B = x_nhwc.shape[0]
    cols, oh, ow = _space_to_depth(x_nhwc, k)
    w2d = jnp.transpose(w_oihw, (2, 3, 1, 0)).reshape(k * k * I, O).astype(jnp.bfloat16)
    y = matmul_bias(cols.reshape(B * oh * ow, k * k * I).astype(jnp.bfloat16),
                    w2d, bias)
    return y.reshape(B, oh, ow, O)


# --------------------------- Downsample: 3x3 s=2 p=1 conv --------------------

def _downsample_kernel(p00_ref, p01_ref, p10_ref, p11_ref, w_ref, b_ref, o_ref):
    """3x3 stride-2 pad-1 conv for one image, gathering taps from 4 parity planes.

    Planes p_{r}{c}[a, b, :] = x_pad[2a + r, 2b + c, :]; output row a needs
    only unit-offset contiguous slices of the planes (no strided loads, no
    im2col materialization)."""
    planes = (p00_ref, p01_ref, p10_ref, p11_ref)
    oh, ow, O = o_ref.shape[1], o_ref.shape[2], o_ref.shape[3]
    bias = b_ref[...].astype(jnp.float32)                  # (1, O)

    def row_body(a, carry):
        acc = jnp.zeros((ow, O), jnp.float32)
        for t in range(9):                                  # static 3x3 taps
            i, j = t // 3, t % 3
            da, pi = i // 2, i % 2
            db, qj = j // 2, j % 2
            win = planes[pi * 2 + qj][0, a + da, pl.ds(db, ow), :]   # (ow, C)
            acc = acc + jnp.dot(win, w_ref[t],
                                preferred_element_type=jnp.float32)
        o_ref[0, a, :, :] = (acc + bias).astype(o_ref.dtype)
        return carry

    lax.fori_loop(0, oh, row_body, 0)


def conv2d_down3x3(x_nhwc, w_oihw, bias):
    """Downsample proj: Conv2d(k=3, s=2, p=1) without im2col HBM blow-up."""
    B, H, W, C = x_nhwc.shape
    assert H % 2 == 0 and W % 2 == 0, (H, W)
    O = w_oihw.shape[0]
    oh, ow = H // 2, W // 2

    xp = jnp.pad(x_nhwc.astype(jnp.bfloat16), ((0, 0), (1, 1), (1, 1), (0, 0)))
    p00 = xp[:, 0::2, 0::2, :]                              # (B, oh+1, ow+1, C)
    p01 = xp[:, 0::2, 1::2, :]
    p10 = xp[:, 1::2, 0::2, :]
    p11 = xp[:, 1::2, 1::2, :]

    w_taps = jnp.transpose(w_oihw, (2, 3, 1, 0)).reshape(9, C, O).astype(jnp.bfloat16)
    b2d = bias.reshape(1, O).astype(jnp.float32)

    plane_spec = pl.BlockSpec((1, oh + 1, ow + 1, C), lambda b: (b, 0, 0, 0))
    out = pl.pallas_call(
        _downsample_kernel,
        out_shape=jax.ShapeDtypeStruct((B, oh, ow, O), jnp.bfloat16),
        grid=(B,),
        in_specs=[plane_spec, plane_spec, plane_spec, plane_spec,
                  pl.BlockSpec((9, C, O), _const_map(3)),
                  pl.BlockSpec((1, O), _const_map(2))],
        out_specs=pl.BlockSpec((1, oh, ow, O), lambda b: (b, 0, 0, 0)),
        compiler_params=pltpu.CompilerParams(
            dimension_semantics=("parallel",),
            vmem_limit_bytes=_VMEM_LIMIT),
    )(p00, p01, p10, p11, w_taps, b2d)
    return out


# --------------------------- parameters --------------------------------------

def _normal(key, shape, fan_in, dtype=jnp.float32):
    w = jax.random.normal(key, shape, dtype=jnp.float32) / jnp.sqrt(float(fan_in))
    return w.astype(dtype)


def init_monet_params(key, *, image_size=16, in_chans=3, patch_size=(2, 2),
                      embed_dim=(16, 32), layers=(1, 1), expansion_factor=(3, 3),
                      transitions=(True,)):
    ks = iter(jax.random.split(key, 256))
    p = {}
    ps0 = patch_size[0]
    # fs: Conv2d(in_chans, embed_dim[0], k=ps0, s=ps0)   (lecun-normal style)
    p['fs_w'] = _normal(next(ks), (embed_dim[0], in_chans, ps0, ps0), in_chans * ps0 * ps0)
    p['fs_b'] = jnp.zeros((embed_dim[0],), jnp.float32)
    # fs2: Conv2d(embed_dim[0], embed_dim[0], k=2, s=2)
    p['fs2_w'] = _normal(next(ks), (embed_dim[0], embed_dim[0], 2, 2), embed_dim[0] * 4)
    p['fs2_b'] = jnp.zeros((embed_dim[0],), jnp.float32)

    hw = image_size // ps0 // 2              # spatial side entering stage 0
    stages = []
    for i in range(len(layers)):
        dim, exp = embed_dim[i], expansion_factor[i]
        P = hw * hw
        half = dim // 2
        hid = (dim * exp) // 2
        blocks = []
        for _ in range(layers[i]):
            blocks.append(dict(
                ln_w=jnp.ones((1, dim), jnp.float32),
                ln_b=jnp.zeros((1, dim), jnp.float32),
                m1_w1=_normal(next(ks), (dim, half), dim, jnp.bfloat16),
                m1_w2=_normal(next(ks), (dim, half), dim, jnp.bfloat16),
                m1_ws=_normal(next(ks), (P, P), P, jnp.bfloat16),   # token mixing
                m1_w3=_normal(next(ks), (half, dim), half, jnp.bfloat16),
                m1_b3=jnp.zeros((1, dim), jnp.float32),
                m2_w1=_normal(next(ks), (dim, hid), dim, jnp.bfloat16),
                m2_w2=_normal(next(ks), (dim, hid), dim, jnp.bfloat16),
                m2_w3=_normal(next(ks), (hid, dim), hid, jnp.bfloat16),
                m2_b3=jnp.zeros((1, dim), jnp.float32),
            ))
        stage = dict(blocks=blocks, downsample=None)
        if i < len(layers) - 1 and (transitions[i] or embed_dim[i] != embed_dim[i + 1]):
            # Downsample: Conv2d(dim, embed_dim[i+1], k=3, s=2, p=1)
            stage['downsample'] = dict(
                w=_normal(next(ks), (embed_dim[i + 1], dim, 3, 3), dim * 9),
                b=jnp.zeros((embed_dim[i + 1],), jnp.float32),
            )
            hw = (hw + 2 - 3) // 2 + 1
        stages.append(stage)
    p['stages'] = stages
    return p


# --------------------------- forward ------------------------------------------

def monet_forward(params, x_nchw, task_id=0):
    # layout: input NCHW (PyTorch) -> internal NHWC -> output NCHW
    del task_id   # TODO(synk): task/LoRA routing not reproducible (PolyMlp source missing)
    x = jnp.transpose(x_nchw, (0, 2, 3, 1)).astype(jnp.float32)

    # fs (k=ps0,s=ps0) and fs2 (k=2,s=2) are both linear with no nonlinearity
    # in between: compose exactly into ONE k=2*ps0, s=2*ps0 conv.
    w1, b1 = params['fs_w'], params['fs_b']                # (E0, Cin, k1, k1)
    w2, b2 = params['fs2_w'], params['fs2_b']              # (E0, E0,  k2, k2)
    k1, k2 = w1.shape[2], w2.shape[2]
    wc = jnp.einsum('omyx,mcab->ocyaxb', w2, w1)           # Y = k1*y2 + y1, X = k1*x2 + x1
    wc = wc.reshape(w2.shape[0], w1.shape[1], k2 * k1, k2 * k1)
    bc = b2 + jnp.einsum('omyx,m->o', w2, b1)
    x = conv2d_patch(x, wc, bc)

    for stage in params['stages']:
        # basic_blocks: 'b c h w -> b h w c' (already NHWC here), then PolyBlocks
        for blk in stage['blocks']:
            x = polyblock_apply(x, blk)
        if stage['downsample'] is not None:
            x = conv2d_down3x3(x, stage['downsample']['w'], stage['downsample']['b'])

    # NOTE: MONet.forward returns the feature map; self.head is not applied.
    return jnp.transpose(x, (0, 3, 1, 2)).astype(jnp.float32)


# --------------------------- main ----------------------------------------------

if __name__ == "__main__":
    key = jax.random.PRNGKey(0)
    kp, kx = jax.random.split(key)
    params = init_monet_params(kp)
    x = jax.random.normal(kx, (2, 3, 16, 16), dtype=jnp.float32)   # NCHW, like PyTorch
    fwd = jax.jit(partial(monet_forward, params))
    y = fwd(x)
    jax.block_until_ready(y)
    assert y.shape == (2, 32, 2, 2), y.shape
    assert bool(jnp.all(jnp.isfinite(y)))
    print("KERNEL_OK")
</pallas_src>

<mosaic_0001>
module attributes {stable_mosaic.version = 11 : i64} {
  func.func @_matmul_bias_kernel(%arg0: i32, %arg1: i32, %arg2: i32, %arg3: memref<32x48xbf16, #tpu.memory_space<vmem>>, %arg4: memref<48x128xbf16, #tpu.memory_space<vmem>>, %arg5: memref<1x128xf32, #tpu.memory_space<vmem>>, %arg6: memref<32x128xbf16, #tpu.memory_space<vmem>>, %arg7: memref<32x128xf32, #tpu.memory_space<vmem>>) attributes {dimension_semantics = [#tpu.dimension_semantics<parallel>, #tpu.dimension_semantics<parallel>, #tpu.dimension_semantics<arbitrary>], iteration_bounds = array<i64: 1, 1, 1>, scalar_prefetch = 0 : i64, scratch_operands = 1 : i64, tpu.core_type = #tpu.core_type<tc>, window_params = [{transform_indices = @transform_0, window_bounds = array<i64: 32, 48>}, {transform_indices = @transform_1, window_bounds = array<i64: 48, 128>}, {transform_indices = @transform_2, window_bounds = array<i64: 1, 128>}, {transform_indices = @transform_3, window_bounds = array<i64: 32, 128>}]} {
    %c0_i32 = arith.constant 0 : i32
    %0 = arith.cmpi eq, %arg2, %c0_i32 : i32
    %1 = arith.extui %0 : i1 to i32
    %c0_i32_0 = arith.constant 0 : i32
    %2 = arith.cmpi ne, %1, %c0_i32_0 : i32
    scf.if %2 {
      %cst_10 = arith.constant 0.000000e+00 : f32
      %12 = vector.broadcast %cst_10 : f32 to vector<32x128xf32>
      %c0_11 = arith.constant 0 : index
      %c0_12 = arith.constant 0 : index
      %13 = vector.load %arg7[%c0_11, %c0_12] : memref<32x128xf32, #tpu.memory_space<vmem>>, vector<32x128xf32>
      tpu.vector_store %arg7[%c0_11, %c0_12], %12 {strides = array<i32>} : memref<32x128xf32, #tpu.memory_space<vmem>>, vector<32x128xf32>,
    } else {
    }
    %c0 = arith.constant 0 : index
    %c0_1 = arith.constant 0 : index
    %3 = vector.load %arg7[%c0, %c0_1] : memref<32x128xf32, #tpu.memory_space<vmem>>, vector<32x128xf32>
    %c0_2 = arith.constant 0 : index
    %c0_3 = arith.constant 0 : index
    %4 = vector.load %arg3[%c0_2, %c0_3] : memref<32x48xbf16, #tpu.memory_space<vmem>>, vector<32x48xbf16>
    %c0_4 = arith.constant 0 : index
    %c0_5 = arith.constant 0 : index
    %5 = vector.load %arg4[%c0_4, %c0_5] : memref<48x128xbf16, #tpu.memory_space<vmem>>, vector<48x128xbf16>
    %cst = arith.constant dense<0.000000e+00> : vector<32x128xf32>
    %6 = tpu.matmul %4, %5, %cst {dimension_numbers = #tpu.dot_dimension_numbers<[1], [0], [0], [1], [0, 0, 1, 1], [], []>} : vector<32x48xbf16>, vector<48x128xbf16>, vector<32x128xf32> -> vector<32x128xf32>
    %7 = arith.addf %3, %6 : vector<32x128xf32>
    %c0_6 = arith.constant 0 : index
    %c0_7 = arith.constant 0 : index
    %8 = vector.load %arg7[%c0_6, %c0_7] : memref<32x128xf32, #tpu.memory_space<vmem>>, vector<32x128xf32>
    tpu.vector_store %arg7[%c0_6, %c0_7], %7 {strides = array<i32>} : memref<32x128xf32, #tpu.memory_space<vmem>>, vector<32x128xf32>,
    %c0_i32_8 = arith.constant 0 : i32
    %9 = arith.cmpi eq, %arg2, %c0_i32_8 : i32
    %10 = arith.extui %9 : i1 to i32
    %c0_i32_9 = arith.constant 0 : i32
    %11 = arith.cmpi ne, %10, %c0_i32_9 : i32
    scf.if %11 {
      %c0_10 = arith.constant 0 : index
      %c0_11 = arith.constant 0 : index
      %12 = vector.load %arg7[%c0_10, %c0_11] : memref<32x128xf32, #tpu.memory_space<vmem>>, vector<32x128xf32>
      %c0_12 = arith.constant 0 : index
      %c0_13 = arith.constant 0 : index
      %13 = vector.load %arg5[%c0_12, %c0_13] : memref<1x128xf32, #tpu.memory_space<vmem>>, vector<1x128xf32>
      %14 = vector.broadcast %13 : vector<1x128xf32> to vector<32x128xf32>
      %15 = arith.addf %12, %14 : vector<32x128xf32>
      %16 = arith.truncf %15 : vector<32x128xf32> to vector<32x128xbf16>
      %c0_14 = arith.constant 0 : index
      %c0_15 = arith.constant 0 : index
      %17 = vector.load %arg6[%c0_14, %c0_15] : memref<32x128xbf16, #tpu.memory_space<vmem>>, vector<32x128xbf16>
      tpu.vector_store %arg6[%c0_14, %c0_15], %16 {strides = array<i32>} : memref<32x128xbf16, #tpu.memory_space<vmem>>, vector<32x128xbf16>,
    } else {
    }
    return
  }
  func.func @transform_0(%arg0: i32, %arg1: i32, %arg2: i32) -> (i32, i32) {
    %c0_i32 = arith.constant 0 : i32
    return %arg0, %arg2 : i32, i32
  }
  func.func @transform_1(%arg0: i32, %arg1: i32, %arg2: i32) -> (i32, i32) {
    %c0_i32 = arith.constant 0 : i32
    return %arg2, %arg1 : i32, i32
  }
  func.func @transform_2(%arg0: i32, %arg1: i32, %arg2: i32) -> (i32, i32) {
    %c0_i32 = arith.constant 0 : i32
    %c0_i32_0 = arith.constant 0 : i32
    return %c0_i32, %arg1 : i32, i32
  }
  func.func @transform_3(%arg0: i32, %arg1: i32, %arg2: i32) -> (i32, i32) {
    %c0_i32 = arith.constant 0 : i32
    return %arg0, %arg1 : i32, i32
  }
}

module attributes {stable_mosaic.version = 11 : i64} {
  func.func @_polyblock_kernel(%arg0: i32, %arg1: memref<1x16x16xbf16, #tpu.memory_space<vmem>>, %arg2: memref<1x16xf32, #tpu.memory_space<vmem>>, %arg3: memref<1x16xf32, #tpu.memory_space<vmem>>, %arg4: memref<16x8xbf16, #tpu.memory_space<vmem>>, %arg5: memref<16x8xbf16, #tpu.memory_space<vmem>>, %arg6: memref<16x16xbf16, #tpu.memory_space<vmem>>, %arg7: memref<8x16xbf16, #tpu.memory_space<vmem>>, %arg8: memref<1x16xf32, #tpu.memory_space<vmem>>, %arg9: memref<16x24xbf16, #tpu.memory_space<vmem>>, %arg10: memref<16x24xbf16, #tpu.memory_space<vmem>>, %arg11: memref<24x16xbf16, #tpu.memory_space<vmem>>, %arg12: memref<1x16xf32, #tpu.memory_space<vmem>>, %arg13: memref<1x16x16xbf16, #tpu.memory_space<vmem>>) attributes {dimension_semantics = [#tpu.dimension_semantics<parallel>], iteration_bounds = array<i64: 2>, scalar_prefetch = 0 : i64, scratch_operands = 0 : i64, tpu.core_type = #tpu.core_type<tc>, window_params = [{transform_indices = @transform_0, window_bounds = array<i64: 1, 16, 16>}, {pipeline_mode = #tpu.pipeline_mode<synchronous>, transform_indices = @transform_1, window_bounds = array<i64: 1, 16>}, {pipeline_mode = #tpu.pipeline_mode<synchronous>, transform_indices = @transform_2, window_bounds = array<i64: 1, 16>}, {pipeline_mode = #tpu.pipeline_mode<synchronous>, transform_indices = @transform_3, window_bounds = array<i64: 16, 8>}, {pipeline_mode = #tpu.pipeline_mode<synchronous>, transform_indices = @transform_4, window_bounds = array<i64: 16, 8>}, {pipeline_mode = #tpu.pipeline_mode<synchronous>, transform_indices = @transform_5, window_bounds = array<i64: 16, 16>}, {pipeline_mode = #tpu.pipeline_mode<synchronous>, transform_indices = @transform_6, window_bounds = array<i64: 8, 16>}, {pipeline_mode = #tpu.pipeline_mode<synchronous>, transform_indices = @transform_7, window_bounds = array<i64: 1, 16>}, {pipeline_mode = #tpu.pipeline_mode<synchronous>, transform_indices = @transform_8, window_bounds = array<i64: 16, 24>}, {pipeline_mode = #tpu.pipeline_mode<synchronous>, transform_indices = @transform_9, window_bounds = array<i64: 16, 24>}, {pipeline_mode = #tpu.pipeline_mode<synchronous>, transform_indices = @transform_10, window_bounds = array<i64: 24, 16>}, {pipeline_mode = #tpu.pipeline_mode<synchronous>, transform_indices = @transform_11, window_bounds = array<i64: 1, 16>}, {transform_indices = @transform_12, window_bounds = array<i64: 1, 16, 16>}]} {
    %c0 = arith.constant 0 : index
    %c0_0 = arith.constant 0 : index
    %c0_1 = arith.constant 0 : index
    %0 = vector.load %arg1[%c0, %c0_0, %c0_1] : memref<1x16x16xbf16, #tpu.memory_space<vmem>>, vector<1x16x16xbf16>
    %1 = vector.shape_cast %0 : vector<1x16x16xbf16> to vector<16x16xbf16>
    %2 = arith.extf %1 : vector<16x16xbf16> to vector<16x16xf32>
    %c0_2 = arith.constant 0 : index
    %c0_3 = arith.constant 0 : index
    %3 = vector.load %arg2[%c0_2, %c0_3] : memref<1x16xf32, #tpu.memory_space<vmem>>, vector<1x16xf32>
    %4 = vector.shape_cast %3 : vector<1x16xf32> to vector<1x16xf32>
    %5 = vector.broadcast %4 : vector<1x16xf32> to vector<16x16xf32>
    %c0_4 = arith.constant 0 : index
    %c0_5 = arith.constant 0 : index
    %6 = vector.load %arg3[%c0_4, %c0_5] : memref<1x16xf32, #tpu.memory_space<vmem>>, vector<1x16xf32>
    %7 = vector.shape_cast %6 : vector<1x16xf32> to vector<1x16xf32>
    %8 = vector.broadcast %7 : vector<1x16xf32> to vector<16x16xf32>
    %c0_6 = arith.constant 0 : index
    %c0_7 = arith.constant 0 : index
    %9 = vector.load %arg8[%c0_6, %c0_7] : memref<1x16xf32, #tpu.memory_space<vmem>>, vector<1x16xf32>
    %c0_8 = arith.constant 0 : index
    %c0_9 = arith.constant 0 : index
    %10 = vector.load %arg12[%c0_8, %c0_9] : memref<1x16xf32, #tpu.memory_space<vmem>>, vector<1x16xf32>
    %cst = arith.constant dense<0.000000e+00> : vector<16xf32>
    %11 = vector.multi_reduction <add>, %2, %cst [1] : vector<16x16xf32> to vector<16xf32>
    %12 = vector.shape_cast %11 : vector<16xf32> to vector<16x1xf32>
    %cst_10 = arith.constant 1.600000e+01 : f32
    %13 = vector.broadcast %cst_10 : f32 to vector<16x1xf32>
    %14 = arith.divf %12, %13 : vector<16x1xf32>
    %15 = arith.mulf %2, %2 : vector<16x16xf32>
    %cst_11 = arith.constant dense<0.000000e+00> : vector<16xf32>
    %16 = vector.multi_reduction <add>, %15, %cst_11 [1] : vector<16x16xf32> to vector<16xf32>
    %17 = vector.shape_cast %16 : vector<16xf32> to vector<16x1xf32>
    %cst_12 = arith.constant 1.600000e+01 : f32
    %18 = vector.broadcast %cst_12 : f32 to vector<16x1xf32>
    %19 = arith.divf %17, %18 : vector<16x1xf32>
    %20 = arith.mulf %14, %14 : vector<16x1xf32>
    %21 = arith.subf %19, %20 : vector<16x1xf32>
    %cst_13 = arith.constant 0.000000e+00 : f32
    %22 = vector.broadcast %cst_13 : f32 to vector<16x1xf32>
    %23 = arith.maximumf %21, %22 : vector<16x1xf32>
    %24 = vector.broadcast %14 : vector<16x1xf32> to vector<16x16xf32>
    %25 = arith.subf %2, %24 : vector<16x16xf32>
    %cst_14 = arith.constant 9.99999997E-7 : f32
    %26 = vector.broadcast %cst_14 : f32 to vector<16x1xf32>
    %27 = arith.addf %23, %26 : vector<16x1xf32>
    %28 = math.rsqrt %27 : vector<16x1xf32>
    %29 = vector.broadcast %28 : vector<16x1xf32> to vector<16x16xf32>
    %30 = arith.mulf %25, %29 : vector<16x16xf32>
    %31 = arith.mulf %30, %5 : vector<16x16xf32>
    %32 = arith.addf %31, %8 : vector<16x16xf32>
    %33 = arith.truncf %32 : vector<16x16xf32> to vector<16x16xbf16>
    %c0_15 = arith.constant 0 : index
    %c0_16 = arith.constant 0 : index
    %34 = vector.load %arg4[%c0_15, %c0_16] : memref<16x8xbf16, #tpu.memory_space<vmem>>, vector<16x8xbf16>
    %cst_17 = arith.constant dense<0.000000e+00> : vector<16x8xf32>
    %35 = tpu.matmul %33, %34, %cst_17 {dimension_numbers = #tpu.dot_dimension_numbers<[1], [0], [0], [1], [0, 0, 1, 1], [], []>} : vector<16x16xbf16>, vector<16x8xbf16>, vector<16x8xf32> -> vector<16x8xf32>
    %c0_18 = arith.constant 0 : index
    %c0_19 = arith.constant 0 : index
    %36 = vector.load %arg5[%c0_18, %c0_19] : memref<16x8xbf16, #tpu.memory_space<vmem>>, vector<16x8xbf16>
    %cst_20 = arith.constant dense<0.000000e+00> : vector<16x8xf32>
    %37 = tpu.matmul %33, %36, %cst_20 {dimension_numbers = #tpu.dot_dimension_numbers<[1], [0], [0], [1], [0, 0, 1, 1], [], []>} : vector<16x16xbf16>, vector<16x8xbf16>, vector<16x8xf32> -> vector<16x8xf32>
    %c0_21 = arith.constant 0 : index
    %c0_22 = arith.constant 0 : index
    %38 = vector.load %arg6[%c0_21, %c0_22] : memref<16x16xbf16, #tpu.memory_space<vmem>>, vector<16x16xbf16>
    %39 = arith.truncf %37 : vector<16x8xf32> to vector<16x8xbf16>
    %cst_23 = arith.constant dense<0.000000e+00> : vector<16x8xf32>
    %40 = tpu.matmul %38, %39, %cst_23 {dimension_numbers = #tpu.dot_dimension_numbers<[1], [0], [0], [1], [0, 0, 1, 1], [], []>} : vector<16x16xbf16>, vector<16x8xbf16>, vector<16x8xf32> -> vector<16x8xf32>
    %41 = arith.mulf %35, %40 : vector<16x8xf32>
    %42 = arith.truncf %41 : vector<16x8xf32> to vector<16x8xbf16>
    %c0_24 = arith.constant 0 : index
    %c0_25 = arith.constant 0 : index
    %43 = vector.load %arg7[%c0_24, %c0_25] : memref<8x16xbf16, #tpu.memory_space<vmem>>, vector<8x16xbf16>
    %cst_26 = arith.constant dense<0.000000e+00> : vector<16x16xf32>
    %44 = tpu.matmul %42, %43, %cst_26 {dimension_numbers = #tpu.dot_dimension_numbers<[1], [0], [0], [1], [0, 0, 1, 1], [], []>} : vector<16x8xbf16>, vector<8x16xbf16>, vector<16x16xf32> -> vector<16x16xf32>
    %45 = arith.addf %2, %44 : vector<16x16xf32>
    %46 = vector.broadcast %9 : vector<1x16xf32> to vector<16x16xf32>
    %47 = arith.addf %45, %46 : vector<16x16xf32>
    %cst_27 = arith.constant dense<0.000000e+00> : vector<16xf32>
    %48 = vector.multi_reduction <add>, %47, %cst_27 [1] : vector<16x16xf32> to vector<16xf32>
    %49 = vector.shape_cast %48 : vector<16xf32> to vector<16x1xf32>
    %cst_28 = arith.constant 1.600000e+01 : f32
    %50 = vector.broadcast %cst_28 : f32 to vector<16x1xf32>
    %51 = arith.divf %49, %50 : vector<16x1xf32>
    %52 = arith.mulf %47, %47 : vector<16x16xf32>
    %cst_29 = arith.constant dense<0.000000e+00> : vector<16xf32>
    %53 = vector.multi_reduction <add>, %52, %cst_29 [1] : vector<16x16xf32> to vector<16xf32>
    %54 = vector.shape_cast %53 : vector<16xf32> to vector<16x1xf32>
    %cst_30 = arith.constant 1.600000e+01 : f32
    %55 = vector.broadcast %cst_30 : f32 to vector<16x1xf32>
    %56 = arith.divf %54, %55 : vector<16x1xf32>
    %57 = arith.mulf %51, %51 : vector<16x1xf32>
    %58 = arith.subf %56, %57 : vector<16x1xf32>
    %cst_31 = arith.constant 0.000000e+00 : f32
    %59 = vector.broadcast %cst_31 : f32 to vector<16x1xf32>
    %60 = arith.maximumf %58, %59 : vector<16x1xf32>
    %61 = vector.broadcast %51 : vector<16x1xf32> to vector<16x16xf32>
    %62 = arith.subf %47, %61 : vector<16x16xf32>
    %cst_32 = arith.constant 9.99999997E-7 : f32
    %63 = vector.broadcast %cst_32 : f32 to vector<16x1xf32>
    %64 = arith.addf %60, %63 : vector<16x1xf32>
    %65 = math.rsqrt %64 : vector<16x1xf32>
    %66 = vector.broadcast %65 : vector<16x1xf32> to vector<16x16xf32>
    %67 = arith.mulf %62, %66 : vector<16x16xf32>
    %68 = arith.mulf %67, %5 : vector<16x16xf32>
    %69 = arith.addf %68, %8 : vector<16x16xf32>
    %70 = arith.truncf %69 : vector<16x16xf32> to vector<16x16xbf16>
    %c0_33 = arith.constant 0 : index
    %c0_34 = arith.constant 0 : index
    %71 = vector.load %arg9[%c0_33, %c0_34] : memref<16x24xbf16, #tpu.memory_space<vmem>>, vector<16x24xbf16>
    %cst_35 = arith.constant dense<0.000000e+00> : vector<16x24xf32>
    %72 = tpu.matmul %70, %71, %cst_35 {dimension_numbers = #tpu.dot_dimension_numbers<[1], [0], [0], [1], [0, 0, 1, 1], [], []>} : vector<16x16xbf16>, vector<16x24xbf16>, vector<16x24xf32> -> vector<16x24xf32>
    %c0_36 = arith.constant 0 : index
    %c0_37 = arith.constant 0 : index
    %73 = vector.load %arg10[%c0_36, %c0_37] : memref<16x24xbf16, #tpu.memory_space<vmem>>, vector<16x24xbf16>
    %cst_38 = arith.constant dense<0.000000e+00> : vector<16x24xf32>
    %74 = tpu.matmul %70, %73, %cst_38 {dimension_numbers = #tpu.dot_dimension_numbers<[1], [0], [0], [1], [0, 0, 1, 1], [], []>} : vector<16x16xbf16>, vector<16x24xbf16>, vector<16x24xf32> -> vector<16x24xf32>
    %75 = arith.mulf %72, %74 : vector<16x24xf32>
    %76 = arith.truncf %75 : vector<16x24xf32> to vector<16x24xbf16>
    %c0_39 = arith.constant 0 : index
    %c0_40 = arith.constant 0 : index
    %77 = vector.load %arg11[%c0_39, %c0_40] : memref<24x16xbf16, #tpu.memory_space<vmem>>, vector<24x16xbf16>
    %cst_41 = arith.constant dense<0.000000e+00> : vector<16x16xf32>
    %78 = tpu.matmul %76, %77, %cst_41 {dimension_numbers = #tpu.dot_dimension_numbers<[1], [0], [0], [1], [0, 0, 1, 1], [], []>} : vector<16x24xbf16>, vector<24x16xbf16>, vector<16x16xf32> -> vector<16x16xf32>
    %79 = arith.addf %47, %78 : vector<16x16xf32>
    %80 = vector.broadcast %10 : vector<1x16xf32> to vector<16x16xf32>
    %81 = arith.addf %79, %80 : vector<16x16xf32>
    %82 = arith.truncf %81 : vector<16x16xf32> to vector<16x16xbf16>
    %c0_42 = arith.constant 0 : index
    %c0_43 = arith.constant 0 : index
    %c0_44 = arith.constant 0 : index
    %83 = vector.load %arg13[%c0_42, %c0_43, %c0_44] : memref<1x16x16xbf16, #tpu.memory_space<vmem>>, vector<1x16x16xbf16>
    %84 = vector.shape_cast %83 : vector<1x16x16xbf16> to vector<16x16xbf16>
    %85 = vector.shape_cast %82 : vector<16x16xbf16> to vector<1x16x16xbf16>
    tpu.vector_store %arg13[%c0_42, %c0_43, %c0_44], %85 {strides = array<i32>} : memref<1x16x16xbf16, #tpu.memory_space<vmem>>, vector<1x16x16xbf16>,
    return
  }
  func.func @transform_0(%arg0: i32) -> (i32, i32, i32) {
    %c0_i32 = arith.constant 0 : i32
    %c0_i32_0 = arith.constant 0 : i32
    %c0_i32_1 = arith.constant 0 : i32
    return %arg0, %c0_i32, %c0_i32_0 : i32, i32, i32
  }
  func.func @transform_1(%arg0: i32) -> (i32, i32) {
    %c0_i32 = arith.constant 0 : i32
    %c0_i32_0 = arith.constant 0 : i32
    %c0_i32_1 = arith.constant 0 : i32
    return %c0_i32, %c0_i32_0 : i32, i32
  }
  func.func @transform_2(%arg0: i32) -> (i32, i32) {
    %c0_i32 = arith.constant 0 : i32
    %c0_i32_0 = arith.constant 0 : i32
    %c0_i32_1 = arith.constant 0 : i32
    return %c0_i32, %c0_i32_0 : i32, i32
  }
  func.func @transform_3(%arg0: i32) -> (i32, i32) {
    %c0_i32 = arith.constant 0 : i32
    %c0_i32_0 = arith.constant 0 : i32
    %c0_i32_1 = arith.constant 0 : i32
    return %c0_i32, %c0_i32_0 : i32, i32
  }
  func.func @transform_4(%arg0: i32) -> (i32, i32) {
    %c0_i32 = arith.constant 0 : i32
    %c0_i32_0 = arith.constant 0 : i32
    %c0_i32_1 = arith.constant 0 : i32
    return %c0_i32, %c0_i32_0 : i32, i32
  }
  func.func @transform_5(%arg0: i32) -> (i32, i32) {
    %c0_i32 = arith.constant 0 : i32
    %c0_i32_0 = arith.constant 0 : i32
    %c0_i32_1 = arith.constant 0 : i32
    return %c0_i32, %c0_i32_0 : i32, i32
  }
  func.func @transform_6(%arg0: i32) -> (i32, i32) {
    %c0_i32 = arith.constant 0 : i32
    %c0_i32_0 = arith.constant 0 : i32
    %c0_i32_1 = arith.constant 0 : i32
    return %c0_i32, %c0_i32_0 : i32, i32
  }
  func.func @transform_7(%arg0: i32) -> (i32, i32) {
    %c0_i32 = arith.constant 0 : i32
    %c0_i32_0 = arith.constant 0 : i32
    %c0_i32_1 = arith.constant 0 : i32
    return %c0_i32, %c0_i32_0 : i32, i32
  }
  func.func @transform_8(%arg0: i32) -> (i32, i32) {
    %c0_i32 = arith.constant 0 : i32
    %c0_i32_0 = arith.constant 0 : i32
    %c0_i32_1 = arith.constant 0 : i32
    return %c0_i32, %c0_i32_0 : i32, i32
  }
  func.func @transform_9(%arg0: i32) -> (i32, i32) {
    %c0_i32 = arith.constant 0 : i32
    %c0_i32_0 = arith.constant 0 : i32
    %c0_i32_1 = arith.constant 0 : i32
    return %c0_i32, %c0_i32_0 : i32, i32
  }
  func.func @transform_10(%arg0: i32) -> (i32, i32) {
    %c0_i32 = arith.constant 0 : i32
    %c0_i32_0 = arith.constant 0 : i32
    %c0_i32_1 = arith.constant 0 : i32
    return %c0_i32, %c0_i32_0 : i32, i32
  }
  func.func @transform_11(%arg0: i32) -> (i32, i32) {
    %c0_i32 = arith.constant 0 : i32
    %c0_i32_0 = arith.constant 0 : i32
    %c0_i32_1 = arith.constant 0 : i32
    return %c0_i32, %c0_i32_0 : i32, i32
  }
  func.func @transform_12(%arg0: i32) -> (i32, i32, i32) {
    %c0_i32 = arith.constant 0 : i32
    %c0_i32_0 = arith.constant 0 : i32
    %c0_i32_1 = arith.constant 0 : i32
    return %arg0, %c0_i32, %c0_i32_0 : i32, i32, i32
  }
}

module attributes {stable_mosaic.version = 11 : i64} {
  func.func @_downsample_kernel(%arg0: i32, %arg1: memref<1x3x3x16xbf16, #tpu.memory_space<vmem>>, %arg2: memref<1x3x3x16xbf16, #tpu.memory_space<vmem>>, %arg3: memref<1x3x3x16xbf16, #tpu.memory_space<vmem>>, %arg4: memref<1x3x3x16xbf16, #tpu.memory_space<vmem>>, %arg5: memref<9x16x32xbf16, #tpu.memory_space<vmem>>, %arg6: memref<1x32xf32, #tpu.memory_space<vmem>>, %arg7: memref<1x2x2x32xbf16, #tpu.memory_space<vmem>>) attributes {dimension_semantics = [#tpu.dimension_semantics<parallel>], iteration_bounds = array<i64: 2>, scalar_prefetch = 0 : i64, scratch_operands = 0 : i64, tpu.core_type = #tpu.core_type<tc>, window_params = [{transform_indices = @transform_0, window_bounds = array<i64: 1, 3, 3, 16>}, {transform_indices = @transform_1, window_bounds = array<i64: 1, 3, 3, 16>}, {transform_indices = @transform_2, window_bounds = array<i64: 1, 3, 3, 16>}, {transform_indices = @transform_3, window_bounds = array<i64: 1, 3, 3, 16>}, {pipeline_mode = #tpu.pipeline_mode<synchronous>, transform_indices = @transform_4, window_bounds = array<i64: 9, 16, 32>}, {pipeline_mode = #tpu.pipeline_mode<synchronous>, transform_indices = @transform_5, window_bounds = array<i64: 1, 32>}, {transform_indices = @transform_6, window_bounds = array<i64: 1, 2, 2, 32>}]} {
    %c0 = arith.constant 0 : index
    %c0_0 = arith.constant 0 : index
    %0 = vector.load %arg6[%c0, %c0_0] : memref<1x32xf32, #tpu.memory_space<vmem>>, vector<1x32xf32>
    %c0_i32 = arith.constant 0 : i32
    %c2_i32 = arith.constant 2 : i32
    %1 = arith.addi %c0_i32, %c2_i32 : i32
    %c1_i32 = arith.constant 1 : i32
    scf.for %arg8 = %c0_i32 to %1 step %c1_i32  : i32 {
      %cst = arith.constant 0.000000e+00 : f32
      %2 = vector.broadcast %cst : f32 to vector<2x32xf32>
      %c0_i32_2 = arith.constant 0 : i32
      %3 = arith.addi %arg8, %c0_i32_2 : i32
      %c0_3 = arith.constant 0 : index
      %4 = arith.index_cast %3 : i32 to index
      %c0_4 = arith.constant 0 : index
      %c0_5 = arith.constant 0 : index
      %5 = vector.load %arg1[%c0_3, %4, %c0_4, %c0_5] : memref<1x3x3x16xbf16, #tpu.memory_space<vmem>>, vector<1x1x2x16xbf16>
      %6 = vector.shape_cast %5 : vector<1x1x2x16xbf16> to vector<2x16xbf16>
      %c0_6 = arith.constant 0 : index
      %c0_7 = arith.constant 0 : index
      %c0_8 = arith.constant 0 : index
      %7 = vector.load %arg5[%c0_6, %c0_7, %c0_8] : memref<9x16x32xbf16, #tpu.memory_space<vmem>>, vector<1x16x32xbf16>
      %8 = vector.shape_cast %7 : vector<1x16x32xbf16> to vector<16x32xbf16>
      %cst_9 = arith.constant dense<0.000000e+00> : vector<2x32xf32>
      %9 = tpu.matmul %6, %8, %cst_9 {dimension_numbers = #tpu.dot_dimension_numbers<[1], [0], [0], [1], [0, 0, 1, 1], [], []>} : vector<2x16xbf16>, vector<16x32xbf16>, vector<2x32xf32> -> vector<2x32xf32>
      %10 = arith.addf %2, %9 : vector<2x32xf32>
      %c0_i32_10 = arith.constant 0 : i32
      %11 = arith.addi %arg8, %c0_i32_10 : i32
      %c0_11 = arith.constant 0 : index
      %12 = arith.index_cast %11 : i32 to index
      %c0_12 = arith.constant 0 : index
      %c0_13 = arith.constant 0 : index
      %13 = vector.load %arg2[%c0_11, %12, %c0_12, %c0_13] : memref<1x3x3x16xbf16, #tpu.memory_space<vmem>>, vector<1x1x2x16xbf16>
      %14 = vector.shape_cast %13 : vector<1x1x2x16xbf16> to vector<2x16xbf16>
      %c1 = arith.constant 1 : index
      %c0_14 = arith.constant 0 : index
      %c0_15 = arith.constant 0 : index
      %15 = vector.load %arg5[%c1, %c0_14, %c0_15] : memref<9x16x32xbf16, #tpu.memory_space<vmem>>, vector<1x16x32xbf16>
      %16 = vector.shape_cast %15 : vector<1x16x32xbf16> to vector<16x32xbf16>
      %cst_16 = arith.constant dense<0.000000e+00> : vector<2x32xf32>
      %17 = tpu.matmul %14, %16, %cst_16 {dimension_numbers = #tpu.dot_dimension_numbers<[1], [0], [0], [1], [0, 0, 1, 1], [], []>} : vector<2x16xbf16>, vector<16x32xbf16>, vector<2x32xf32> -> vector<2x32xf32>
      %18 = arith.addf %10, %17 : vector<2x32xf32>
      %c0_i32_17 = arith.constant 0 : i32
      %19 = arith.addi %arg8, %c0_i32_17 : i32
      %c0_18 = arith.constant 0 : index
      %20 = arith.index_cast %19 : i32 to index
      %c1_19 = arith.constant 1 : index
      %c0_20 = arith.constant 0 : index
      %21 = vector.load %arg1[%c0_18, %20, %c1_19, %c0_20] : memref<1x3x3x16xbf16, #tpu.memory_space<vmem>>, vector<1x1x2x16xbf16>
      %22 = vector.shape_cast %21 : vector<1x1x2x16xbf16> to vector<2x16xbf16>
      %c2 = arith.constant 2 : index
      %c0_21 = arith.constant 0 : index
      %c0_22 = arith.constant 0 : index
      %23 = vector.load %arg5[%c2, %c0_21, %c0_22] : memref<9x16x32xbf16, #tpu.memory_space<vmem>>, vector<1x16x32xbf16>
      %24 = vector.shape_cast %23 : vector<1x16x32xbf16> to vector<16x32xbf16>
      %cst_23 = arith.constant dense<0.000000e+00> : vector<2x32xf32>
      %25 = tpu.matmul %22, %24, %cst_23 {dimension_numbers = #tpu.dot_dimension_numbers<[1], [0], [0], [1], [0, 0, 1, 1], [], []>} : vector<2x16xbf16>, vector<16x32xbf16>, vector<2x32xf32> -> vector<2x32xf32>
      %26 = arith.addf %18, %25 : vector<2x32xf32>
      %c0_i32_24 = arith.constant 0 : i32
      %27 = arith.addi %arg8, %c0_i32_24 : i32
      %c0_25 = arith.constant 0 : index
      %28 = arith.index_cast %27 : i32 to index
      %c0_26 = arith.constant 0 : index
      %c0_27 = arith.constant 0 : index
      %29 = vector.load %arg3[%c0_25, %28, %c0_26, %c0_27] : memref<1x3x3x16xbf16, #tpu.memory_space<vmem>>, vector<1x1x2x16xbf16>
      %30 = vector.shape_cast %29 : vector<1x1x2x16xbf16> to vector<2x16xbf16>
      %c3 = arith.constant 3 : index
      %c0_28 = arith.constant 0 : index
      %c0_29 = arith.constant 0 : index
      %31 = vector.load %arg5[%c3, %c0_28, %c0_29] : memref<9x16x32xbf16, #tpu.memory_space<vmem>>, vector<1x16x32xbf16>
      %32 = vector.shape_cast %31 : vector<1x16x32xbf16> to vector<16x32xbf16>
      %cst_30 = arith.constant dense<0.000000e+00> : vector<2x32xf32>
      %33 = tpu.matmul %30, %32, %cst_30 {dimension_numbers = #tpu.dot_dimension_numbers<[1], [0], [0], [1], [0, 0, 1, 1], [], []>} : vector<2x16xbf16>, vector<16x32xbf16>, vector<2x32xf32> -> vector<2x32xf32>
      %34 = arith.addf %26, %33 : vector<2x32xf32>
      %c0_i32_31 = arith.constant 0 : i32
      %35 = arith.addi %arg8, %c0_i32_31 : i32
      %c0_32 = arith.constant 0 : index
      %36 = arith.index_cast %35 : i32 to index
      %c0_33 = arith.constant 0 : index
      %c0_34 = arith.constant 0 : index
      %37 = vector.load %arg4[%c0_32, %36, %c0_33, %c0_34] : memref<1x3x3x16xbf16, #tpu.memory_space<vmem>>, vector<1x1x2x16xbf16>
      %38 = vector.shape_cast %37 : vector<1x1x2x16xbf16> to vector<2x16xbf16>
      %c4 = arith.constant 4 : index
      %c0_35 = arith.constant 0 : index
      %c0_36 = arith.constant 0 : index
      %39 = vector.load %arg5[%c4, %c0_35, %c0_36] : memref<9x16x32xbf16, #tpu.memory_space<vmem>>, vector<1x16x32xbf16>
      %40 = vector.shape_cast %39 : vector<1x16x32xbf16> to vector<16x32xbf16>
      %cst_37 = arith.constant dense<0.000000e+00> : vector<2x32xf32>
      %41 = tpu.matmul %38, %40, %cst_37 {dimension_numbers = #tpu.dot_dimension_numbers<[1], [0], [0], [1], [0, 0, 1, 1], [], []>} : vector<2x16xbf16>, vector<16x32xbf16>, vector<2x32xf32> -> vector<2x32xf32>
      %42 = arith.addf %34, %41 : vector<2x32xf32>
      %c0_i32_38 = arith.constant 0 : i32
      %43 = arith.addi %arg8, %c0_i32_38 : i32
      %c0_39 = arith.constant 0 : index
      %44 = arith.index_cast %43 : i32 to index
      %c1_40 = arith.constant 1 : index
      %c0_41 = arith.constant 0 : index
      %45 = vector.load %arg3[%c0_39, %44, %c1_40, %c0_41] : memref<1x3x3x16xbf16, #tpu.memory_space<vmem>>, vector<1x1x2x16xbf16>
      %46 = vector.shape_cast %45 : vector<1x1x2x16xbf16> to vector<2x16xbf16>
      %c5 = arith.constant 5 : index
      %c0_42 = arith.constant 0 : index
      %c0_43 = arith.constant 0 : index
      %47 = vector.load %arg5[%c5, %c0_42, %c0_43] : memref<9x16x32xbf16, #tpu.memory_space<vmem>>, vector<1x16x32xbf16>
      %48 = vector.shape_cast %47 : vector<1x16x32xbf16> to vector<16x32xbf16>
      %cst_44 = arith.constant dense<0.000000e+00> : vector<2x32xf32>
      %49 = tpu.matmul %46, %48, %cst_44 {dimension_numbers = #tpu.dot_dimension_numbers<[1], [0], [0], [1], [0, 0, 1, 1], [], []>} : vector<2x16xbf16>, vector<16x32xbf16>, vector<2x32xf32> -> vector<2x32xf32>
      %50 = arith.addf %42, %49 : vector<2x32xf32>
      %c1_i32_45 = arith.constant 1 : i32
      %51 = arith.addi %arg8, %c1_i32_45 : i32
      %c0_46 = arith.constant 0 : index
      %52 = arith.index_cast %51 : i32 to index
      %c0_47 = arith.constant 0 : index
      %c0_48 = arith.constant 0 : index
      %53 = vector.load %arg1[%c0_46, %52, %c0_47, %c0_48] : memref<1x3x3x16xbf16, #tpu.memory_space<vmem>>, vector<1x1x2x16xbf16>
      %54 = vector.shape_cast %53 : vector<1x1x2x16xbf16> to vector<2x16xbf16>
      %c6 = arith.constant 6 : index
      %c0_49 = arith.constant 0 : index
      %c0_50 = arith.constant 0 : index
      %55 = vector.load %arg5[%c6, %c0_49, %c0_50] : memref<9x16x32xbf16, #tpu.memory_space<vmem>>, vector<1x16x32xbf16>
      %56 = vector.shape_cast %55 : vector<1x16x32xbf16> to vector<16x32xbf16>
      %cst_51 = arith.constant dense<0.000000e+00> : vector<2x32xf32>
      %57 = tpu.matmul %54, %56, %cst_51 {dimension_numbers = #tpu.dot_dimension_numbers<[1], [0], [0], [1], [0, 0, 1, 1], [], []>} : vector<2x16xbf16>, vector<16x32xbf16>, vector<2x32xf32> -> vector<2x32xf32>
      %58 = arith.addf %50, %57 : vector<2x32xf32>
      %c1_i32_52 = arith.constant 1 : i32
      %59 = arith.addi %arg8, %c1_i32_52 : i32
      %c0_53 = arith.constant 0 : index
      %60 = arith.index_cast %59 : i32 to index
      %c0_54 = arith.constant 0 : index
      %c0_55 = arith.constant 0 : index
      %61 = vector.load %arg2[%c0_53, %60, %c0_54, %c0_55] : memref<1x3x3x16xbf16, #tpu.memory_space<vmem>>, vector<1x1x2x16xbf16>
      %62 = vector.shape_cast %61 : vector<1x1x2x16xbf16> to vector<2x16xbf16>
      %c7 = arith.constant 7 : index
      %c0_56 = arith.constant 0 : index
      %c0_57 = arith.constant 0 : index
      %63 = vector.load %arg5[%c7, %c0_56, %c0_57] : memref<9x16x32xbf16, #tpu.memory_space<vmem>>, vector<1x16x32xbf16>
      %64 = vector.shape_cast %63 : vector<1x16x32xbf16> to vector<16x32xbf16>
      %cst_58 = arith.constant dense<0.000000e+00> : vector<2x32xf32>
      %65 = tpu.matmul %62, %64, %cst_58 {dimension_numbers = #tpu.dot_dimension_numbers<[1], [0], [0], [1], [0, 0, 1, 1], [], []>} : vector<2x16xbf16>, vector<16x32xbf16>, vector<2x32xf32> -> vector<2x32xf32>
      %66 = arith.addf %58, %65 : vector<2x32xf32>
      %c1_i32_59 = arith.constant 1 : i32
      %67 = arith.addi %arg8, %c1_i32_59 : i32
      %c0_60 = arith.constant 0 : index
      %68 = arith.index_cast %67 : i32 to index
      %c1_61 = arith.constant 1 : index
      %c0_62 = arith.constant 0 : index
      %69 = vector.load %arg1[%c0_60, %68, %c1_61, %c0_62] : memref<1x3x3x16xbf16, #tpu.memory_space<vmem>>, vector<1x1x2x16xbf16>
      %70 = vector.shape_cast %69 : vector<1x1x2x16xbf16> to vector<2x16xbf16>
      %c8 = arith.constant 8 : index
      %c0_63 = arith.constant 0 : index
      %c0_64 = arith.constant 0 : index
      %71 = vector.load %arg5[%c8, %c0_63, %c0_64] : memref<9x16x32xbf16, #tpu.memory_space<vmem>>, vector<1x16x32xbf16>
      %72 = vector.shape_cast %71 : vector<1x16x32xbf16> to vector<16x32xbf16>
      %cst_65 = arith.constant dense<0.000000e+00> : vector<2x32xf32>
      %73 = tpu.matmul %70, %72, %cst_65 {dimension_numbers = #tpu.dot_dimension_numbers<[1], [0], [0], [1], [0, 0, 1, 1], [], []>} : vector<2x16xbf16>, vector<16x32xbf16>, vector<2x32xf32> -> vector<2x32xf32>
      %74 = arith.addf %66, %73 : vector<2x32xf32>
      %75 = vector.broadcast %0 : vector<1x32xf32> to vector<2x32xf32>
      %76 = arith.addf %74, %75 : vector<2x32xf32>
      %77 = arith.truncf %76 : vector<2x32xf32> to vector<2x32xbf16>
      %c0_66 = arith.constant 0 : index
      %78 = arith.index_cast %arg8 : i32 to index
      %c0_67 = arith.constant 0 : index
      %c0_68 = arith.constant 0 : index
      %79 = vector.load %arg7[%c0_66, %78, %c0_67, %c0_68] : memref<1x2x2x32xbf16, #tpu.memory_space<vmem>>, vector<1x1x2x32xbf16>
      %80 = vector.shape_cast %79 : vector<1x1x2x32xbf16> to vector<2x32xbf16>
      %81 = vector.shape_cast %77 : vector<2x32xbf16> to vector<1x1x2x32xbf16>
      tpu.vector_store %arg7[%c0_66, %78, %c0_67, %c0_68], %81 {strides = array<i32>} : memref<1x2x2x32xbf16, #tpu.memory_space<vmem>>, vector<1x1x2x32xbf16>,
    }
    %c2_i32_1 = arith.constant 2 : i32
    return
  }
  func.func @transform_0(%arg0: i32) -> (i32, i32, i32, i32) {
    %c0_i32 = arith.constant 0 : i32
    %c0_i32_0 = arith.constant 0 : i32
    %c0_i32_1 = arith.constant 0 : i32
    %c0_i32_2 = arith.constant 0 : i32
    return %arg0, %c0_i32, %c0_i32_0, %c0_i32_1 : i32, i32, i32, i32
  }
  func.func @transform_1(%arg0: i32) -> (i32, i32, i32, i32) {
    %c0_i32 = arith.constant 0 : i32
    %c0_i32_0 = arith.constant 0 : i32
    %c0_i32_1 = arith.constant 0 : i32
    %c0_i32_2 = arith.constant 0 : i32
    return %arg0, %c0_i32, %c0_i32_0, %c0_i32_1 : i32, i32, i32, i32
  }
  func.func @transform_2(%arg0: i32) -> (i32, i32, i32, i32) {
    %c0_i32 = arith.constant 0 : i32
    %c0_i32_0 = arith.constant 0 : i32
    %c0_i32_1 = arith.constant 0 : i32
    %c0_i32_2 = arith.constant 0 : i32
    return %arg0, %c0_i32, %c0_i32_0, %c0_i32_1 : i32, i32, i32, i32
  }
  func.func @transform_3(%arg0: i32) -> (i32, i32, i32, i32) {
    %c0_i32 = arith.constant 0 : i32
    %c0_i32_0 = arith.constant 0 : i32
    %c0_i32_1 = arith.constant 0 : i32
    %c0_i32_2 = arith.constant 0 : i32
    return %arg0, %c0_i32, %c0_i32_0, %c0_i32_1 : i32, i32, i32, i32
  }
  func.func @transform_4(%arg0: i32) -> (i32, i32, i32) {
    %c0_i32 = arith.constant 0 : i32
    %c0_i32_0 = arith.constant 0 : i32
    %c0_i32_1 = arith.constant 0 : i32
    %c0_i32_2 = arith.constant 0 : i32
    return %c0_i32, %c0_i32_0, %c0_i32_1 : i32, i32, i32
  }
  func.func @transform_5(%arg0: i32) -> (i32, i32) {
    %c0_i32 = arith.constant 0 : i32
    %c0_i32_0 = arith.constant 0 : i32
    %c0_i32_1 = arith.constant 0 : i32
    return %c0_i32, %c0_i32_0 : i32, i32
  }
  func.func @transform_6(%arg0: i32) -> (i32, i32, i32, i32) {
    %c0_i32 = arith.constant 0 : i32
    %c0_i32_0 = arith.constant 0 : i32
    %c0_i32_1 = arith.constant 0 : i32
    %c0_i32_2 = arith.constant 0 : i32
    return %arg0, %c0_i32, %c0_i32_0, %c0_i32_1 : i32, i32, i32, i32
  }
}

module attributes {stable_mosaic.version = 11 : i64} {
  func.func @_polyblock_kernel(%arg0: i32, %arg1: memref<1x8x32xbf16, #tpu.memory_space<vmem>>, %arg2: memref<1x32xf32, #tpu.memory_space<vmem>>, %arg3: memref<1x32xf32, #tpu.memory_space<vmem>>, %arg4: memref<32x16xbf16, #tpu.memory_space<vmem>>, %arg5: memref<32x16xbf16, #tpu.memory_space<vmem>>, %arg6: memref<8x8xbf16, #tpu.memory_space<vmem>>, %arg7: memref<16x32xbf16, #tpu.memory_space<vmem>>, %arg8: memref<1x32xf32, #tpu.memory_space<vmem>>, %arg9: memref<32x48xbf16, #tpu.memory_space<vmem>>, %arg10: memref<32x48xbf16, #tpu.memory_space<vmem>>, %arg11: memref<48x32xbf16, #tpu.memory_space<vmem>>, %arg12: memref<1x32xf32, #tpu.memory_space<vmem>>, %arg13: memref<1x8x32xbf16, #tpu.memory_space<vmem>>) attributes {dimension_semantics = [#tpu.dimension_semantics<parallel>], iteration_bounds = array<i64: 2>, scalar_prefetch = 0 : i64, scratch_operands = 0 : i64, tpu.core_type = #tpu.core_type<tc>, window_params = [{transform_indices = @transform_0, window_bounds = array<i64: 1, 8, 32>}, {pipeline_mode = #tpu.pipeline_mode<synchronous>, transform_indices = @transform_1, window_bounds = array<i64: 1, 32>}, {pipeline_mode = #tpu.pipeline_mode<synchronous>, transform_indices = @transform_2, window_bounds = array<i64: 1, 32>}, {pipeline_mode = #tpu.pipeline_mode<synchronous>, transform_indices = @transform_3, window_bounds = array<i64: 32, 16>}, {pipeline_mode = #tpu.pipeline_mode<synchronous>, transform_indices = @transform_4, window_bounds = array<i64: 32, 16>}, {pipeline_mode = #tpu.pipeline_mode<synchronous>, transform_indices = @transform_5, window_bounds = array<i64: 8, 8>}, {pipeline_mode = #tpu.pipeline_mode<synchronous>, transform_indices = @transform_6, window_bounds = array<i64: 16, 32>}, {pipeline_mode = #tpu.pipeline_mode<synchronous>, transform_indices = @transform_7, window_bounds = array<i64: 1, 32>}, {pipeline_mode = #tpu.pipeline_mode<synchronous>, transform_indices = @transform_8, window_bounds = array<i64: 32, 48>}, {pipeline_mode = #tpu.pipeline_mode<synchronous>, transform_indices = @transform_9, window_bounds = array<i64: 32, 48>}, {pipeline_mode = #tpu.pipeline_mode<synchronous>, transform_indices = @transform_10, window_bounds = array<i64: 48, 32>}, {pipeline_mode = #tpu.pipeline_mode<synchronous>, transform_indices = @transform_11, window_bounds = array<i64: 1, 32>}, {transform_indices = @transform_12, window_bounds = array<i64: 1, 8, 32>}]} {
    %c0 = arith.constant 0 : index
    %c0_0 = arith.constant 0 : index
    %c0_1 = arith.constant 0 : index
    %0 = vector.load %arg1[%c0, %c0_0, %c0_1] : memref<1x8x32xbf16, #tpu.memory_space<vmem>>, vector<1x8x32xbf16>
    %1 = vector.shape_cast %0 : vector<1x8x32xbf16> to vector<8x32xbf16>
    %2 = arith.extf %1 : vector<8x32xbf16> to vector<8x32xf32>
    %c0_2 = arith.constant 0 : index
    %c0_3 = arith.constant 0 : index
    %3 = vector.load %arg2[%c0_2, %c0_3] : memref<1x32xf32, #tpu.memory_space<vmem>>, vector<1x32xf32>
    %4 = vector.shape_cast %3 : vector<1x32xf32> to vector<1x32xf32>
    %5 = vector.broadcast %4 : vector<1x32xf32> to vector<8x32xf32>
    %c0_4 = arith.constant 0 : index
    %c0_5 = arith.constant 0 : index
    %6 = vector.load %arg3[%c0_4, %c0_5] : memref<1x32xf32, #tpu.memory_space<vmem>>, vector<1x32xf32>
    %7 = vector.shape_cast %6 : vector<1x32xf32> to vector<1x32xf32>
    %8 = vector.broadcast %7 : vector<1x32xf32> to vector<8x32xf32>
    %c0_6 = arith.constant 0 : index
    %c0_7 = arith.constant 0 : index
    %9 = vector.load %arg8[%c0_6, %c0_7] : memref<1x32xf32, #tpu.memory_space<vmem>>, vector<1x32xf32>
    %c0_8 = arith.constant 0 : index
    %c0_9 = arith.constant 0 : index
    %10 = vector.load %arg12[%c0_8, %c0_9] : memref<1x32xf32, #tpu.memory_space<vmem>>, vector<1x32xf32>
    %cst = arith.constant dense<0.000000e+00> : vector<8xf32>
    %11 = vector.multi_reduction <add>, %2, %cst [1] : vector<8x32xf32> to vector<8xf32>
    %12 = vector.shape_cast %11 : vector<8xf32> to vector<8x1xf32>
    %cst_10 = arith.constant 3.200000e+01 : f32
    %13 = vector.broadcast %cst_10 : f32 to vector<8x1xf32>
    %14 = arith.divf %12, %13 : vector<8x1xf32>
    %15 = arith.mulf %2, %2 : vector<8x32xf32>
    %cst_11 = arith.constant dense<0.000000e+00> : vector<8xf32>
    %16 = vector.multi_reduction <add>, %15, %cst_11 [1] : vector<8x32xf32> to vector<8xf32>
    %17 = vector.shape_cast %16 : vector<8xf32> to vector<8x1xf32>
    %cst_12 = arith.constant 3.200000e+01 : f32
    %18 = vector.broadcast %cst_12 : f32 to vector<8x1xf32>
    %19 = arith.divf %17, %18 : vector<8x1xf32>
    %20 = arith.mulf %14, %14 : vector<8x1xf32>
    %21 = arith.subf %19, %20 : vector<8x1xf32>
    %cst_13 = arith.constant 0.000000e+00 : f32
    %22 = vector.broadcast %cst_13 : f32 to vector<8x1xf32>
    %23 = arith.maximumf %21, %22 : vector<8x1xf32>
    %24 = vector.broadcast %14 : vector<8x1xf32> to vector<8x32xf32>
    %25 = arith.subf %2, %24 : vector<8x32xf32>
    %cst_14 = arith.constant 9.99999997E-7 : f32
    %26 = vector.broadcast %cst_14 : f32 to vector<8x1xf32>
    %27 = arith.addf %23, %26 : vector<8x1xf32>
    %28 = math.rsqrt %27 : vector<8x1xf32>
    %29 = vector.broadcast %28 : vector<8x1xf32> to vector<8x32xf32>
    %30 = arith.mulf %25, %29 : vector<8x32xf32>
    %31 = arith.mulf %30, %5 : vector<8x32xf32>
    %32 = arith.addf %31, %8 : vector<8x32xf32>
    %33 = arith.truncf %32 : vector<8x32xf32> to vector<8x32xbf16>
    %c0_15 = arith.constant 0 : index
    %c0_16 = arith.constant 0 : index
    %34 = vector.load %arg4[%c0_15, %c0_16] : memref<32x16xbf16, #tpu.memory_space<vmem>>, vector<32x16xbf16>
    %cst_17 = arith.constant dense<0.000000e+00> : vector<8x16xf32>
    %35 = tpu.matmul %33, %34, %cst_17 {dimension_numbers = #tpu.dot_dimension_numbers<[1], [0], [0], [1], [0, 0, 1, 1], [], []>} : vector<8x32xbf16>, vector<32x16xbf16>, vector<8x16xf32> -> vector<8x16xf32>
    %c0_18 = arith.constant 0 : index
    %c0_19 = arith.constant 0 : index
    %36 = vector.load %arg5[%c0_18, %c0_19] : memref<32x16xbf16, #tpu.memory_space<vmem>>, vector<32x16xbf16>
    %cst_20 = arith.constant dense<0.000000e+00> : vector<8x16xf32>
    %37 = tpu.matmul %33, %36, %cst_20 {dimension_numbers = #tpu.dot_dimension_numbers<[1], [0], [0], [1], [0, 0, 1, 1], [], []>} : vector<8x32xbf16>, vector<32x16xbf16>, vector<8x16xf32> -> vector<8x16xf32>
    %c0_21 = arith.constant 0 : index
    %c0_22 = arith.constant 0 : index
    %38 = vector.load %arg6[%c0_21, %c0_22] : memref<8x8xbf16, #tpu.memory_space<vmem>>, vector<8x8xbf16>
    %39 = arith.truncf %37 : vector<8x16xf32> to vector<8x16xbf16>
    %cst_23 = arith.constant dense<0.000000e+00> : vector<8x16xf32>
    %40 = tpu.matmul %38, %39, %cst_23 {dimension_numbers = #tpu.dot_dimension_numbers<[1], [0], [0], [1], [0, 0, 1, 1], [], []>} : vector<8x8xbf16>, vector<8x16xbf16>, vector<8x16xf32> -> vector<8x16xf32>
    %41 = arith.mulf %35, %40 : vector<8x16xf32>
    %42 = arith.truncf %41 : vector<8x16xf32> to vector<8x16xbf16>
    %c0_24 = arith.constant 0 : index
    %c0_25 = arith.constant 0 : index
    %43 = vector.load %arg7[%c0_24, %c0_25] : memref<16x32xbf16, #tpu.memory_space<vmem>>, vector<16x32xbf16>
    %cst_26 = arith.constant dense<0.000000e+00> : vector<8x32xf32>
    %44 = tpu.matmul %42, %43, %cst_26 {dimension_numbers = #tpu.dot_dimension_numbers<[1], [0], [0], [1], [0, 0, 1, 1], [], []>} : vector<8x16xbf16>, vector<16x32xbf16>, vector<8x32xf32> -> vector<8x32xf32>
    %45 = arith.addf %2, %44 : vector<8x32xf32>
    %46 = vector.broadcast %9 : vector<1x32xf32> to vector<8x32xf32>
    %47 = arith.addf %45, %46 : vector<8x32xf32>
    %cst_27 = arith.constant dense<0.000000e+00> : vector<8xf32>
    %48 = vector.multi_reduction <add>, %47, %cst_27 [1] : vector<8x32xf32> to vector<8xf32>
    %49 = vector.shape_cast %48 : vector<8xf32> to vector<8x1xf32>
    %cst_28 = arith.constant 3.200000e+01 : f32
    %50 = vector.broadcast %cst_28 : f32 to vector<8x1xf32>
    %51 = arith.divf %49, %50 : vector<8x1xf32>
    %52 = arith.mulf %47, %47 : vector<8x32xf32>
    %cst_29 = arith.constant dense<0.000000e+00> : vector<8xf32>
    %53 = vector.multi_reduction <add>, %52, %cst_29 [1] : vector<8x32xf32> to vector<8xf32>
    %54 = vector.shape_cast %53 : vector<8xf32> to vector<8x1xf32>
    %cst_30 = arith.constant 3.200000e+01 : f32
    %55 = vector.broadcast %cst_30 : f32 to vector<8x1xf32>
    %56 = arith.divf %54, %55 : vector<8x1xf32>
    %57 = arith.mulf %51, %51 : vector<8x1xf32>
    %58 = arith.subf %56, %57 : vector<8x1xf32>
    %cst_31 = arith.constant 0.000000e+00 : f32
    %59 = vector.broadcast %cst_31 : f32 to vector<8x1xf32>
    %60 = arith.maximumf %58, %59 : vector<8x1xf32>
    %61 = vector.broadcast %51 : vector<8x1xf32> to vector<8x32xf32>
    %62 = arith.subf %47, %61 : vector<8x32xf32>
    %cst_32 = arith.constant 9.99999997E-7 : f32
    %63 = vector.broadcast %cst_32 : f32 to vector<8x1xf32>
    %64 = arith.addf %60, %63 : vector<8x1xf32>
    %65 = math.rsqrt %64 : vector<8x1xf32>
    %66 = vector.broadcast %65 : vector<8x1xf32> to vector<8x32xf32>
    %67 = arith.mulf %62, %66 : vector<8x32xf32>
    %68 = arith.mulf %67, %5 : vector<8x32xf32>
    %69 = arith.addf %68, %8 : vector<8x32xf32>
    %70 = arith.truncf %69 : vector<8x32xf32> to vector<8x32xbf16>
    %c0_33 = arith.constant 0 : index
    %c0_34 = arith.constant 0 : index
    %71 = vector.load %arg9[%c0_33, %c0_34] : memref<32x48xbf16, #tpu.memory_space<vmem>>, vector<32x48xbf16>
    %cst_35 = arith.constant dense<0.000000e+00> : vector<8x48xf32>
    %72 = tpu.matmul %70, %71, %cst_35 {dimension_numbers = #tpu.dot_dimension_numbers<[1], [0], [0], [1], [0, 0, 1, 1], [], []>} : vector<8x32xbf16>, vector<32x48xbf16>, vector<8x48xf32> -> vector<8x48xf32>
    %c0_36 = arith.constant 0 : index
    %c0_37 = arith.constant 0 : index
    %73 = vector.load %arg10[%c0_36, %c0_37] : memref<32x48xbf16, #tpu.memory_space<vmem>>, vector<32x48xbf16>
    %cst_38 = arith.constant dense<0.000000e+00> : vector<8x48xf32>
    %74 = tpu.matmul %70, %73, %cst_38 {dimension_numbers = #tpu.dot_dimension_numbers<[1], [0], [0], [1], [0, 0, 1, 1], [], []>} : vector<8x32xbf16>, vector<32x48xbf16>, vector<8x48xf32> -> vector<8x48xf32>
    %75 = arith.mulf %72, %74 : vector<8x48xf32>
    %76 = arith.truncf %75 : vector<8x48xf32> to vector<8x48xbf16>
    %c0_39 = arith.constant 0 : index
    %c0_40 = arith.constant 0 : index
    %77 = vector.load %arg11[%c0_39, %c0_40] : memref<48x32xbf16, #tpu.memory_space<vmem>>, vector<48x32xbf16>
    %cst_41 = arith.constant dense<0.000000e+00> : vector<8x32xf32>
    %78 = tpu.matmul %76, %77, %cst_41 {dimension_numbers = #tpu.dot_dimension_numbers<[1], [0], [0], [1], [0, 0, 1, 1], [], []>} : vector<8x48xbf16>, vector<48x32xbf16>, vector<8x32xf32> -> vector<8x32xf32>
    %79 = arith.addf %47, %78 : vector<8x32xf32>
    %80 = vector.broadcast %10 : vector<1x32xf32> to vector<8x32xf32>
    %81 = arith.addf %79, %80 : vector<8x32xf32>
    %82 = arith.truncf %81 : vector<8x32xf32> to vector<8x32xbf16>
    %c0_42 = arith.constant 0 : index
    %c0_43 = arith.constant 0 : index
    %c0_44 = arith.constant 0 : index
    %83 = vector.load %arg13[%c0_42, %c0_43, %c0_44] : memref<1x8x32xbf16, #tpu.memory_space<vmem>>, vector<1x8x32xbf16>
    %84 = vector.shape_cast %83 : vector<1x8x32xbf16> to vector<8x32xbf16>
    %85 = vector.shape_cast %82 : vector<8x32xbf16> to vector<1x8x32xbf16>
    tpu.vector_store %arg13[%c0_42, %c0_43, %c0_44], %85 {strides = array<i32>} : memref<1x8x32xbf16, #tpu.memory_space<vmem>>, vector<1x8x32xbf16>,
    return
  }
  func.func @transform_0(%arg0: i32) -> (i32, i32, i32) {
    %c0_i32 = arith.constant 0 : i32
    %c0_i32_0 = arith.constant 0 : i32
    %c0_i32_1 = arith.constant 0 : i32
    return %arg0, %c0_i32, %c0_i32_0 : i32, i32, i32
  }
  func.func @transform_1(%arg0: i32) -> (i32, i32) {
    %c0_i32 = arith.constant 0 : i32
    %c0_i32_0 = arith.constant 0 : i32
    %c0_i32_1 = arith.constant 0 : i32
    return %c0_i32, %c0_i32_0 : i32, i32
  }
  func.func @transform_2(%arg0: i32) -> (i32, i32) {
    %c0_i32 = arith.constant 0 : i32
    %c0_i32_0 = arith.constant 0 : i32
    %c0_i32_1 = arith.constant 0 : i32
    return %c0_i32, %c0_i32_0 : i32, i32
  }
  func.func @transform_3(%arg0: i32) -> (i32, i32) {
    %c0_i32 = arith.constant 0 : i32
    %c0_i32_0 = arith.constant 0 : i32
    %c0_i32_1 = arith.constant 0 : i32
    return %c0_i32, %c0_i32_0 : i32, i32
  }
  func.func @transform_4(%arg0: i32) -> (i32, i32) {
    %c0_i32 = arith.constant 0 : i32
    %c0_i32_0 = arith.constant 0 : i32
    %c0_i32_1 = arith.constant 0 : i32
    return %c0_i32, %c0_i32_0 : i32, i32
  }
  func.func @transform_5(%arg0: i32) -> (i32, i32) {
    %c0_i32 = arith.constant 0 : i32
    %c0_i32_0 = arith.constant 0 : i32
    %c0_i32_1 = arith.constant 0 : i32
    return %c0_i32, %c0_i32_0 : i32, i32
  }
  func.func @transform_6(%arg0: i32) -> (i32, i32) {
    %c0_i32 = arith.constant 0 : i32
    %c0_i32_0 = arith.constant 0 : i32
    %c0_i32_1 = arith.constant 0 : i32
    return %c0_i32, %c0_i32_0 : i32, i32
  }
  func.func @transform_7(%arg0: i32) -> (i32, i32) {
    %c0_i32 = arith.constant 0 : i32
    %c0_i32_0 = arith.constant 0 : i32
    %c0_i32_1 = arith.constant 0 : i32
    return %c0_i32, %c0_i32_0 : i32, i32
  }
  func.func @transform_8(%arg0: i32) -> (i32, i32) {
    %c0_i32 = arith.constant 0 : i32
    %c0_i32_0 = arith.constant 0 : i32
    %c0_i32_1 = arith.constant 0 : i32
    return %c0_i32, %c0_i32_0 : i32, i32
  }
  func.func @transform_9(%arg0: i32) -> (i32, i32) {
    %c0_i32 = arith.constant 0 : i32
    %c0_i32_0 = arith.constant 0 : i32
    %c0_i32_1 = arith.constant 0 : i32
    return %c0_i32, %c0_i32_0 : i32, i32
  }
  func.func @transform_10(%arg0: i32) -> (i32, i32) {
    %c0_i32 = arith.constant 0 : i32
    %c0_i32_0 = arith.constant 0 : i32
    %c0_i32_1 = arith.constant 0 : i32
    return %c0_i32, %c0_i32_0 : i32, i32
  }
  func.func @transform_11(%arg0: i32) -> (i32, i32) {
    %c0_i32 = arith.constant 0 : i32
    %c0_i32_0 = arith.constant 0 : i32
    %c0_i32_1 = arith.constant 0 : i32
    return %c0_i32, %c0_i32_0 : i32, i32
  }
  func.func @transform_12(%arg0: i32) -> (i32, i32, i32) {
    %c0_i32 = arith.constant 0 : i32
    %c0_i32_0 = arith.constant 0 : i32
    %c0_i32_1 = arith.constant 0 : i32
    return %arg0, %c0_i32, %c0_i32_0 : i32, i32, i32
  }
}

</mosaic_0001>

<bundles_post_ra>
// kernel: monet_forward.4
= control target key start
LH: loop header
LB: loop body
LE: loop exit
PB: predicated region body
PF: predicated region fallthrough
CT: control target
= control target key end

     0   :  { %vm65_vm0 = vcmask 392192   ;;  %s262_s1 = inlined_call_operand.vmem [shape: bf16[48,128], index: 1, kind: input, shape index: {}]   ;;  %s263_s0 = inlined_call_operand.vmem [shape: bf16[32,48], index: 0, kind: input, shape index: {}]   ;;  %s264_s2 = inlined_call_operand.vmem [shape: f32[1,128], index: 2, kind: input, shape index: {}]   ;;  %s265_s3 = inlined_call_operand.vmem [shape: bf16[32,128], index: 3, kind: output, shape index: {}]  }
   0x1   :  { %v213_v0 = vld [vmem:[%s262_s1] sm:$0xff]   ;;  %v214_v1 = vld [vmem:[%s262_s1 + $0x8] sm:$0xff]   ;;  %v215_v3 = vld [vmem:[%s262_s1 + $0x10] sm:$0xff]  }
   0x2   :  { %203 = vmatprep.subr.bf16.mxu0 %v213_v0  ;;  %v216_v2 = vld [vmem:[%s263_s0] sm:$0xff]   ;;  %v217_v4 = vld [vmem:[%s263_s0 + $0x8] sm:$0xff]  }
   0x3   :  { %204 = vmatpush3.bf16.msra.mxu0 %v213_v0  ;;  %209 = vmatprep.mubr.msk.bf16.mxu0 %vm65_vm0, %v216_v2  ;;  %v178_v6 = vld [vmem:[%s264_s2] ss:$0 sm:$0xff] }
   0x4   :  { %205 = vmatprep.subr.bf16.mxu0 %v214_v1 }
   0x7   :  { %206 = vmatpush3.bf16.msra.mxu0 %v214_v1 }
   0x8   :  { %207 = vmatprep.subr.bf16.mxu0 %v215_v3 }
   0xb   :  { %208 = vmatpush3.bf16.msra.mxu0 %v215_v3 }
   0xe   :  { %210 = vmatmul.mubr.msk.bf16.vlgmr.msra.gmra.mrb[0].mxu0 %vm65_vm0, %v217_v4 }
  0xe1   :  { %v211_v5 = vpop.f32.mrb[0].mxu0 }
  0xe2   :  { %v106_v7 = vpop.f32.mrb[1].mxu0  ;;  %v145_v9 = vadd.f32 %v211_v5, %v178_v6 }
  0xe3   :  { %v212_v8 = vpop.f32.mrb[2].mxu0  ;;  %v143_v12 = vadd.f32 %v178_v6, %v106_v7 }
  0xe4   :  { %v146_v10 = vadd.f32 %v212_v8, %v178_v6  ;;  %v109_v11 = vpop.f32.mrb[3].mxu0 }
  0xe5   :  { %v144_v13 = vadd.f32 %v178_v6, %v109_v11 }
  0xe6   :  { %v195_v14 = vpack.c.bf16 %v146_v10, %v145_v9 }
  0xe7   :  { %v190_v15 = vpack.c.bf16 %v144_v13, %v143_v12 }
  0xe8   :  { %197 = vst [vmem:[%s265_s3 + $0x8] sm:$0xff] %v195_v14  }
  0xe9   :  { %191 = vst [vmem:[%s265_s3] sm:$0xff] %v190_v15  }

// kernel: monet_forward.5
= control target key start
LH: loop header
LB: loop body
LE: loop exit
PB: predicated region body
PF: predicated region fallthrough
CT: control target
= control target key end

     0   :  { %s1165_s21 = smov 0   ;;  %s1302_s0 = inlined_call_operand.vmem [shape: bf16[2,16,16], index: 0, kind: input, shape index: {}]   ;;  %s1303_s1 = inlined_call_operand.vmem [shape: f32[1,16], index: 1, kind: input, shape index: {}]   ;;  %s1304_s2 = inlined_call_operand.vmem [shape: f32[1,16], index: 2, kind: input, shape index: {}, may-alias: {2,7,11}]   ;;  %s1305_s3 = inlined_call_operand.vmem [shape: bf16[16,8], index: 3, kind: input, shape index: {}]   ;;  %s1306_s4 = inlined_call_operand.vmem [shape: bf16[16,8], index: 4, kind: input, shape index: {}]   ;;  %s1307_s5 = inlined_call_operand.vmem [shape: bf16[16,16], index: 5, kind: input, shape index: {}]   ;;  %s1308_s6 = inlined_call_operand.vmem [shape: bf16[8,16], index: 6, kind: input, shape index: {}]   ;;  %s1309_s7 = inlined_call_operand.vmem [shape: f32[1,16], index: 7, kind: input, shape index: {}, may-alias: {2,7,11}]   ;;  %s1310_s8 = inlined_call_operand.vmem [shape: bf16[16,24], index: 8, kind: input, shape index: {}]   ;;  %s1311_s9 = inlined_call_operand.vmem [shape: bf16[16,24], index: 9, kind: input, shape index: {}]   ;;  %s1312_s10 = inlined_call_operand.vmem [shape: bf16[24,16], index: 10, kind: input, shape index: {}]   ;;  %s1313_s11 = inlined_call_operand.vmem [shape: f32[1,16], index: 11, kind: input, shape index: {}, may-alias: {2,7,11}]   ;;  %s1314_s12 = inlined_call_operand.vmem [shape: bf16[2,16,16], index: 12, kind: output, shape index: {}]  }
   0x1 LB: > { %s967_s22 = sadd.s32 4294967295, %s1096_s21   ;;  %p971_p0 = scmp.ge.s32.totalorder %s1096_s21, 1  ;;  %s1096_s21 = sphi %s1165_s21, %s22_s21  }
   0x2   : > { %p362_p1 = scmp.lt.s32.totalorder %s1096_s21, 3 }
   0x4   : > { %p363_p2 = pnand %p971_p0, %p362_p1 }
   0x5   : > { %p404_p3 = scmp.lt.s32.totalorder (!%p363_p2), %s967_s22, 1  ;;  %vm435_vm0 = vcmask (!%p363_p2), 130048   ;;  %v1075_v9 = vld [vmem:[%s1305_s3] sm:$0xff] (!%p363_p2)   ;;  %v1098_v11 = vmov (!%p363_p2), 0.0   ;;  %vm1099_vm1 = vmmov (!%p363_p2), 0   ;;  %vm635_vm2 = vcmask (!%p363_p2), 1043456  }
   0x6   : > { %366 = sbr.rel (%p363_p2) target bundleno = 1463 (0x5b7), region = 68  ;;  %v1076_v10 = vld [vmem:[%s1306_s4] sm:$0xff] (!%p363_p2)   ;;  %1021 = vmatprep.subr.bf16.mxu0 (!%p363_p2), %v1098_v11  ;;  %1027 = vmatprep.subr.bf16.mxu1 (!%p363_p2), %v1098_v11  ;;  %vm631_vm3 = vcmask (!%p363_p2), 64512   ;;  %vm843_vm4 = vcmask (!%p363_p2), 195584   ;;  %vm909_vm5 = vcmask (!%p363_p2), 125952  }
   0x7   : > { %1022 = vmatpush3.bf16.msra.mxu0 (!%p363_p2), %v1075_v9  ;;  %1028 = vmatpush3.bf16.msra.mxu1 (!%p363_p2), %v1076_v10  ;;  %v1213_v31 = vld [vmem:[%s1303_s1] ss:$0 sm:$0xff] (!%p363_p2) }
   0x8   : > { %1023 = vmatprep.mubr.msk.bf16.mxu0 (!%p363_p2), %vm1099_vm1, %v1098_v11  ;;  %1029 = vmatprep.mubr.msk.bf16.mxu1 (!%p363_p2), %vm1099_vm1, %v1098_v11  ;;  %v1220_v36 = vld [vmem:[%s1304_s2] ss:$0 sm:$0xff] (!%p363_p2) }
   0x9   : > { %1033 = vmatprep.subr.bf16.mxu0 (!%p363_p2), %v1098_v11  ;;  %1039 = vmatprep.subr.bf16.mxu1 (!%p363_p2), %v1098_v11  ;;  %v1077_v50 = vld [vmem:[%s1307_s5] sm:$0xff] (!%p363_p2)  }
   0xa   : > { %v630_v51 = vld [vmem:[%s1308_s6] sm:$0xf] (!%p363_p2) }
   0xb   : > { %v637_v52 = vsel (!%p363_p2), %vm635_vm2, %v630_v51, 0  ;;  %v985_v60 = vld [vmem:[%s1309_s7] ss:$0 sm:$0xff] (!%p363_p2) }
   0xd   : > { %s1316_s22 = smov (!%p404_p3, %s967_s22), 1 }
   0xe   : > { %s998_s23 = sshll.u32 %s1316_s22, 3 }
   0xf   : > { %s408_s26 = scalar_lea.vmem %s1302_s0, %s998_s23  ;;  %s413_s20 = scalar_lea.vmem %s1314_s12, %s998_s23 }
  0x10   : > { %v1003_v0 = vld [vmem:[%s408_s26] sm:$0xff]  }
  0x11   : > { %v1181_v1 = vunpack.c.l.bf16 %v1003_v0  ;;  %v1183_v2 = vunpack.c.h.bf16 %v1003_v0 }
  0x13   : > { %v436_v3 = vsel %vm435_vm0, %v1181_v1, 0.0  ;;  %v445_v4 = vmul.f32 %v1181_v1, %v1181_v1  ;;  %v446_v5 = vmul.f32 %v1183_v2, %v1183_v2  ;;  %v439_v7 = vsel %vm435_vm0, %v1183_v2, 0.0 }
  0x14   : > { %437 = vadd.xlane.f32.xlu0 %v436_v3 }
  0x15   : > { %v447_v6 = vsel %vm435_vm0, %v445_v4, 0.0  ;;  %v450_v8 = vsel %vm435_vm0, %v446_v5, 0.0 }
  0x16   : > { %448 = vadd.xlane.f32.xlu1 %v447_v6 }
  0x18   : > { %440 = vadd.xlane.f32.xlu0 %v439_v7 }
  0x1a   : > { %451 = vadd.xlane.f32.xlu1 %v450_v8 }
  0xa1   : > { %v438_v12 = vpop.xlane.xlu0 %437 }
  0xa2   : > { %v443_v13 = vmul.f32 0.0625, %v438_v12  ;;  %v1078_v12 = vld [vmem:[%s1310_s8] sm:$0xff]  }
  0xa3   : > { %v449_v14 = vpop.xlane.xlu1 %448 }
  0xa4   : > { %v455_v15 = vmul.f32 %v443_v13, %v443_v13  ;;  %v453_v16 = vmul.f32 0.0625, %v449_v14  ;;  %v461_v28 = vsub.f32 %v1181_v1, %v443_v13  ;;  %v1079_v13 = vld [vmem:[%s1311_s9] sm:$0xff]  }
  0xa5   : > { %v441_v17 = vpop.xlane.xlu0 %440 }
  0xa6   : > { %v457_v18 = vsub.f32 %v453_v16, %v455_v15  ;;  %v444_v19 = vmul.f32 0.0625, %v441_v17 }
  0xa7   : > { %v452_v20 = vpop.xlane.xlu1 %451 }
  0xa8   : > { %v459_v21 = vmax.f32 %v457_v18, 0.0  ;;  %v456_v22 = vmul.f32 %v444_v19, %v444_v19  ;;  %v454_v23 = vmul.f32 0.0625, %v452_v20  ;;  %v462_v32 = vsub.f32 %v1183_v2, %v444_v19 }
  0xaa   : > { %v463_v24 = vadd.f32 1e-06, %v459_v21  ;;  %v458_v25 = vsub.f32 %v454_v23, %v456_v22 }
  0xac   : > { %1082 = vrsqrt.f32 %v463_v24  ;;  %v460_v26 = vmax.f32 %v458_v25, 0.0 }
  0xae   : > { %v464_v27 = vadd.f32 1e-06, %v460_v26 }
  0xb0   : > { %1084 = vrsqrt.f32 %v464_v27 }
  0xb6   : > { %v1083_v29 = vpop.eup %1082 }
  0xb7   : > { %v467_v30 = vmul.f32 %v1083_v29, %v461_v28 }
  0xb9   : > { %v469_v35 = vmul.f32 %v1213_v31, %v467_v30 }
  0xba   : > { %v1085_v33 = vpop.eup %1084 }
  0xbb   : > { %v468_v34 = vmul.f32 %v1085_v33, %v462_v32  ;;  %v471_v38 = vadd.f32 %v1220_v36, %v469_v35 }
  0xbd   : > { %v470_v37 = vmul.f32 %v1213_v31, %v468_v34 }
  0xbf   : > { %v472_v39 = vadd.f32 %v1220_v36, %v470_v37 }
  0xc1   : > { %v473_v40 = vpack.c.bf16 %v472_v39, %v471_v38 }
  0xc3   : > { %1024 = vmatmul.mubr.msk.bf16.vlgmr.msra.gmra.mrb[0].mxu0 %vm435_vm0, %v473_v40  ;;  %1030 = vmatmul.mubr.msk.bf16.vlgmr.msra.gmra.mrb[0].mxu1 %vm435_vm0, %v473_v40 }
  0xc4   : > { %1035 = vmatprep.mubr.msk.bf16.mxu0 %vm1099_vm1, %v1098_v11  ;;  %1041 = vmatprep.mubr.msk.bf16.mxu1 %vm1099_vm1, %v1098_v11 }
  0xc5   : > { %1040 = vmatpush3.bf16.msra.mxu1 %v637_v52 }
  0xc6   : > { %1051 = vmatprep.subr.bf16.mxu1 %v1098_v11 }
 0x196   : > { %v519_v41 = vpop.f32.mrb[0].mxu0  ;;  %v568_v42 = vpop.f32.mrb[0].mxu1 }
 0x197   : > { %v1025_v43 = vpop.f32.mrb[1].mxu0  ;;  %v1031_v44 = vpop.f32.mrb[1].mxu1 }
 0x198   : > { %v522_v45 = vpop.f32.mrb[2].mxu0  ;;  %v571_v46 = vpop.f32.mrb[2].mxu1  ;;  %v1080_v43 = vld [vmem:[%s1312_s10] sm:$0xff]  }
 0x199   : > { %v577_v47 = vpack.c.bf16 %v571_v46, %v568_v42  ;;  %v1026_v48 = vpop.f32.mrb[3].mxu0  ;;  %v1032_v49 = vpop.f32.mrb[3].mxu1 }
 0x19b   : > { %1034 = vmatpush3.bf16.msra.mxu0 %v577_v47 }
 0x19c   : > { %1045 = vmatprep.subr.bf16.mxu0 %v1098_v11 }
 0x19e   : > { %1036 = vmatmul.mubr.msk.bf16.vlgmr.msra.gmra.mrb[4].mxu0 %vm435_vm0, %v1077_v50 }
 0x19f   : > { %1047 = vmatprep.mubr.msk.bf16.mxu0 %vm1099_vm1, %v1098_v11  ;;  %1046 = vmatpush3.bf16.msra.mxu0 %v1078_v12 }
 0x1a0   : > { %1057 = vmatprep.subr.bf16.mxu0 %v1098_v11 }
 0x271   : > { %v620_v53 = vpop.f32.mrb[4].mxu0 }
 0x272   : > { %v627_v54 = vmul.f32 %v620_v53, %v519_v41  ;;  %v1037_v55 = vpop.f32.mrb[5].mxu0 }
 0x273   : > { %v623_v56 = vpop.f32.mrb[6].mxu0 }
 0x274   : > { %v628_v57 = vmul.f32 %v623_v56, %v522_v45  ;;  %v1038_v58 = vpop.f32.mrb[7].mxu0 }
 0x276   : > { %v629_v59 = vpack.c.bf16 %v628_v57, %v627_v54  ;;  %v993_v54 = vld [vmem:[%s1313_s11] ss:$0 sm:$0xff] }
 0x278   : > { %1042 = vmatmul.mubr.msk.bf16.vlgmr.msra.gmra.mrb[4].mxu1 %vm631_vm3, %v629_v59 }
 0x279   : > { %1053 = vmatprep.mubr.msk.bf16.mxu1 %vm1099_vm1, %v1098_v11  ;;  %1052 = vmatpush3.bf16.msra.mxu1 %v1079_v13 }
 0x34b   : > { %v673_v61 = vpop.f32.mrb[4].mxu1 }
 0x34c   : > { %v680_v62 = vadd.f32 %v1181_v1, %v673_v61  ;;  %v1043_v63 = vpop.f32.mrb[5].mxu1 }
 0x34d   : > { %v676_v0 = vpop.f32.mrb[6].mxu1 }
 0x34e   : > { %v1249_v3 = vadd.f32 %v985_v60, %v680_v62  ;;  %v681_v4 = vadd.f32 %v1183_v2, %v676_v0  ;;  %v1044_v5 = vpop.f32.mrb[7].mxu1 }
 0x350   : > { %v1252_v6 = vadd.f32 %v985_v60, %v681_v4  ;;  %v690_v7 = vsel %vm435_vm0, %v1249_v3, 0.0  ;;  %v698_v8 = vmul.f32 %v1249_v3, %v1249_v3 }
 0x351   : > { %691 = vadd.xlane.f32.xlu0 %v690_v7 }
 0x352   : > { %v693_v9 = vsel %vm435_vm0, %v1252_v6, 0.0  ;;  %v699_v1 = vmul.f32 %v1252_v6, %v1252_v6  ;;  %v700_v10 = vsel %vm435_vm0, %v698_v8, 0.0 }
 0x353   : > { %694 = vadd.xlane.f32.xlu1 %v693_v9 }
 0x354   : > { %v703_v2 = vsel %vm435_vm0, %v699_v1, 0.0 }
 0x355   : > { %701 = vadd.xlane.f32.xlu0 %v700_v10 }
 0x357   : > { %704 = vadd.xlane.f32.xlu1 %v703_v2 }
 0x3de   : > { %v692_v14 = vpop.xlane.xlu0 %691 }
 0x3df   : > { %v696_v15 = vmul.f32 0.0625, %v692_v14 }
 0x3e0   : > { %v695_v16 = vpop.xlane.xlu1 %694 }
 0x3e1   : > { %v697_v17 = vmul.f32 0.0625, %v695_v16  ;;  %v708_v19 = vmul.f32 %v696_v15, %v696_v15  ;;  %v714_v30 = vsub.f32 %v1249_v3, %v696_v15 }
 0x3e2   : > { %v702_v18 = vpop.xlane.xlu0 %701 }
 0x3e3   : > { %v706_v20 = vmul.f32 0.0625, %v702_v18  ;;  %v709_v22 = vmul.f32 %v697_v17, %v697_v17  ;;  %v715_v33 = vsub.f32 %v1252_v6, %v697_v17 }
 0x3e4   : > { %v705_v21 = vpop.xlane.xlu1 %704 }
 0x3e5   : > { %v710_v23 = vsub.f32 %v706_v20, %v708_v19  ;;  %v707_v24 = vmul.f32 0.0625, %v705_v21 }
 0x3e7   : > { %v712_v25 = vmax.f32 %v710_v23, 0.0  ;;  %v711_v26 = vsub.f32 %v707_v24, %v709_v22 }
 0x3e9   : > { %v716_v27 = vadd.f32 1e-06, %v712_v25  ;;  %v713_v28 = vmax.f32 %v711_v26, 0.0 }
 0x3eb   : > { %1086 = vrsqrt.f32 %v716_v27  ;;  %v717_v29 = vadd.f32 1e-06, %v713_v28 }
 0x3ed   : > { %1088 = vrsqrt.f32 %v717_v29 }
 0x3f5   : > { %v1087_v32 = vpop.eup %1086 }
 0x3f6   : > { %v720_v34 = vmul.f32 %v1087_v32, %v714_v30 }
 0x3f7   : > { %v1089_v35 = vpop.eup %1088 }
 0x3f8   : > { %v721_v37 = vmul.f32 %v1089_v35, %v715_v33  ;;  %v722_v38 = vmul.f32 %v1213_v31, %v720_v34 }
 0x3fa   : > { %v723_v39 = vmul.f32 %v1213_v31, %v721_v37  ;;  %v724_v40 = vadd.f32 %v1220_v36, %v722_v38  ;;  %v1081_v31 = vld [vmem:[%s1312_s10 + $0x8] ss:$0 sps:$4 sm:$0xff]  }
 0x3fc   : > { %v725_v41 = vadd.f32 %v1220_v36, %v723_v39  ;;  %v848_v36 = vsel %vm635_vm2, %v1081_v31, 0 }
 0x3fe   : > { %v726_v42 = vpack.c.bf16 %v725_v41, %v724_v40 }
 0x400   : > { %1048 = vmatmul.mubr.msk.bf16.vlgmr.msra.gmra.mrb[8].mxu0 %vm435_vm0, %v726_v42  ;;  %1054 = vmatmul.mubr.msk.bf16.vlgmr.msra.gmra.mrb[8].mxu1 %vm435_vm0, %v726_v42 }
 0x401   : > { %1061 = vmatprep.mubr.msk.bf16.mxu0 %vm1099_vm1, %v1098_v11  ;;  %1058 = vmatpush3.bf16.msra.mxu0 %v1080_v43 }
 0x402   : > { %1059 = vmatprep.subr.bf16.mxu0 %v1098_v11 }
 0x405   : > { %1060 = vmatpush3.bf16.msra.mxu0 %v848_v36 }
 0x4d3   : > { %v772_v44 = vpop.f32.mrb[8].mxu0  ;;  %v821_v45 = vpop.f32.mrb[8].mxu1 }
 0x4d4   : > { %v828_v46 = vmul.f32 %v821_v45, %v772_v44  ;;  %v1049_v47 = vpop.f32.mrb[9].mxu0  ;;  %v1055_v48 = vpop.f32.mrb[9].mxu1 }
 0x4d5   : > { %v775_v49 = vpop.f32.mrb[10].mxu0  ;;  %v824_v50 = vpop.f32.mrb[10].mxu1 }
 0x4d6   : > { %v829_v51 = vmul.f32 %v824_v50, %v775_v49  ;;  %v1050_v52 = vpop.f32.mrb[11].mxu0  ;;  %v1056_v53 = vpop.f32.mrb[11].mxu1 }
 0x4d8   : > { %v830_v11 = vpack.c.bf16 %v829_v51, %v828_v46 }
 0x4da   : > { %1062 = vmatmul.mubr.msk.bf16.vlgmr.msra.gmra.mrb[12].mxu0 %vm843_vm4, %v830_v11 }
 0x5ad   : > { %v884_v55 = vpop.f32.mrb[12].mxu0 }
 0x5ae   : > { %v891_v56 = vadd.f32 %v884_v55, %v1249_v3  ;;  %v1063_v57 = vpop.f32.mrb[13].mxu0 }
 0x5af   : > { %v887_v58 = vpop.f32.mrb[14].mxu0 }
 0x5b0   : > { %v899_v59 = vadd.f32 %v993_v54, %v891_v56  ;;  %v892_v60 = vadd.f32 %v887_v58, %v1252_v6  ;;  %v1064_v61 = vpop.f32.mrb[15].mxu0 }
 0x5b2   : > { %v1000_v62 = vpack.c.bf16 %v899_v59, %v899_v59  ;;  %v900_v63 = vadd.f32 %v993_v54, %v892_v60 }
 0x5b4   : > { %910 = vst.msk [vmem:[%s413_s20] sm:$0xf] %vm909_vm5, %v1000_v62  ;;  %v1001_v0 = vpack.c.bf16 %v900_v63, %v900_v63 }
 0x5b6   : > { %911 = vst.msk [vmem:[%s413_s20 + $0x4] sm:$0xf] %vm909_vm5, %v1001_v0 }
 0x5b7 PF: > { %s22_s21 = sadd.s32 1, %s1096_s21  }
 0x5b8   : > { %p19_p4 = scmp.ge.s32.totalorder %s22_s21, 4  }
 0x5ba   :  { %21 = sbr.rel (!%p19_p4) target bundleno = 1 (0x1), region = 98 }

// kernel: monet_forward.6
= control target key start
LH: loop header
LB: loop body
LE: loop exit
PB: predicated region body
PF: predicated region fallthrough
CT: control target
= control target key end

     0   :  { %s1192_s21 = smov 0   ;;  %s1342_s0 = inlined_call_operand.vmem [shape: bf16[2,3,3,16], index: 0, kind: input, shape index: {}]   ;;  %s1343_s1 = inlined_call_operand.vmem [shape: bf16[2,3,3,16], index: 1, kind: input, shape index: {}]   ;;  %s1344_s2 = inlined_call_operand.vmem [shape: bf16[2,3,3,16], index: 2, kind: input, shape index: {}]   ;;  %s1345_s3 = inlined_call_operand.vmem [shape: bf16[2,3,3,16], index: 3, kind: input, shape index: {}]   ;;  %s1346_s4 = inlined_call_operand.vmem [shape: bf16[9,16,32], index: 4, kind: input, shape index: {}]   ;;  %s1347_s5 = inlined_call_operand.vmem [shape: f32[1,32], index: 5, kind: input, shape index: {}]   ;;  %s1348_s6 = inlined_call_operand.vmem [shape: bf16[2,2,2,32], index: 6, kind: output, shape index: {}]  }
   0x1 LB: > { %s980_s22 = sadd.s32 4294967295, %s1149_s21   ;;  %p984_p0 = scmp.ge.s32.totalorder %s1149_s21, 1  ;;  %s1149_s21 = sphi %s1192_s21, %s16_s21  }
   0x2   : > { %p242_p1 = scmp.lt.s32.totalorder %s1149_s21, 3 }
   0x4   : > { %p243_p2 = pnand %p984_p0, %p242_p1 }
   0x5   : > { %p286_p3 = scmp.lt.s32.totalorder (!%p243_p2), %s980_s22, 1  ;;  %v1203_v0 = vld [vmem:[%s1347_s5] ss:$0 sm:$0xff] (!%p243_p2)  ;;  %s1228_s18 = smov (!%p243_p2), 0  }
   0x6   : > { %246 = sbr.rel (%p243_p2) target bundleno = 274 (0x112), region = 44 }
   0xd   : > { %s1350_s22 = smov (!%p286_p3, %s980_s22), 1 }
   0xe   : > { %s1205_s25 = smul.u32 6, %s1350_s22  ;;  %s989_s26 = sshll.u32 %s1350_s22, 1 }
   0xf   : > { %s1210_s29 = scalar_lea.vmem %s1348_s6, %s989_s26 }
  0x10   : > { %s290_s8 = scalar_lea.vmem %s1342_s0, %s1205_s25  ;;  %s295_s11 = scalar_lea.vmem %s1343_s1, %s1205_s25 }
  0x11   : > { %s300_s14 = scalar_lea.vmem %s1344_s2, %s1205_s25  ;;  %s305_s17 = scalar_lea.vmem %s1345_s3, %s1205_s25 }
  0x12 LB: >> { %v1130_v1 = vld [vmem:[%s1346_s4 + $0x8] sm:$0xff]   ;;  %v1155_v2 = vmov 0.0   ;;  %v1131_v3 = vld [vmem:[%s1346_s4] sm:$0xff]   ;;  %vm1156_vm0 = vmmov 0   ;;  %s1244_s24 = sshll.u32 %s1153_s18, 1  ;;  %vm335_vm1 = vcmask 130048   ;;  %s1153_s18 = sphi %s1228_s18, %s317_s18  }
  0x13   : >> { %1057 = vmatprep.subr.bf16.mxu0 %v1155_v2  ;;  %1063 = vmatprep.subr.bf16.mxu1 %v1155_v2  ;;  %s1252_s28 = scalar_lea.vmem %s295_s11, %s1244_s24  ;;  %s1262_s9 = scalar_lea.vmem %s290_s8, %s1244_s24  ;;  %v1132_v4 = vld [vmem:[%s1346_s4 + $0x10] sm:$0xff]   ;;  %v1133_v8 = vld [vmem:[%s1346_s4 + $0x18] sm:$0xff]   ;;  %v1134_v12 = vld [vmem:[%s1346_s4 + $0x20] sm:$0xff]   ;;  %vm869_vm2 = vcmask 253952  }
  0x14   : >> { %1058 = vmatpush3.bf16.msra.mxu0 %v1130_v1  ;;  %1059 = vmatprep.mubr.msk.bf16.mxu0 %vm1156_vm0, %v1155_v2  ;;  %v325_v5 = vld [vmem:[%s1252_s28] sm:$0x1]  ;;  %s498_s20 = scalar_lea.vmem %s300_s14, %s1244_s24  ;;  %v1135_v17 = vld [vmem:[%s1346_s4 + $0x28] sm:$0xff]   ;;  %s554_s10 = scalar_lea.vmem %s305_s17, %s1244_s24  ;;  %v1136_v22 = vld [vmem:[%s1346_s4 + $0x30] sm:$0xff]  }
  0x15   : >> { %1064 = vmatpush3.bf16.msra.mxu1 %v1131_v3  ;;  %1065 = vmatprep.mubr.msk.bf16.mxu1 %vm1156_vm0, %v1155_v2  ;;  %v320_v6 = vld [vmem:[%s1262_s9] sm:$0x1]  ;;  %v1137_v23 = vld [vmem:[%s1346_s4 + $0x38] sm:$0xff]   ;;  %v1019_v26 = vld [vmem:[%s1262_s9 + $0x2] sm:$0x1] }
  0x16   : >> { %1069 = vmatprep.subr.bf16.mxu0 %v1155_v2  ;;  %1075 = vmatprep.subr.bf16.mxu1 %v1155_v2  ;;  %v1000_v7 = vld.sshfl [vmem:[%s1262_s9] sm:$0x3 pattern:$0x76325410]  ;;  %v1025_v28 = vld [vmem:[%s1252_s28 + $0x2] sm:$0x1]  ;;  %s868_s28 = scalar_lea.vmem %s1210_s29, %s1153_s18 }
  0x17   : >> { %1060 = vmatmul.mubr.msk.bf16.vlgmr.msra.gmra.mrb[0].mxu0 %vm335_vm1, %v325_v5  ;;  %v441_v9 = vshrl.u32 %v1000_v7, 16  ;;  %v443_v10 = vshll.u32 %v1000_v7, 16  ;;  %v1015_v13 = vld.sshfl [vmem:[%s498_s20] sm:$0x3 pattern:$0x76325410] }
  0x18   : >> { %1066 = vmatmul.mubr.msk.bf16.vlgmr.msra.gmra.mrb[0].mxu1 %vm335_vm1, %v320_v6  ;;  %1070 = vmatpush3.bf16.msra.mxu0 %v1132_v4  ;;  %v499_v15 = vld [vmem:[%s498_s20] sm:$0x1]  ;;  %v624_v16 = vshll.u32 %v1015_v13, 16  ;;  %v622_v18 = vshrl.u32 %v1015_v13, 16  ;;  %s317_s18 = sadd.s32 1, %s1153_s18  }
  0x19   : >> { %1071 = vmatprep.mubr.msk.bf16.mxu0 %vm1156_vm0, %v1155_v2  ;;  %1076 = vmatpush3.bf16.msra.mxu1 %v1133_v8  ;;  %v445_v11 = vrot.slane %v443_v10, 1  ;;  %v555_v21 = vld [vmem:[%s554_s10] sm:$0x1]  ;;  %p314_p4 = scmp.ge.s32.totalorder %s317_s18, 2  }
  0x1a   : >> { %1081 = vmatprep.subr.bf16.mxu0 %v1155_v2  ;;  %1077 = vmatprep.mubr.msk.bf16.mxu1 %vm1156_vm0, %v1155_v2  ;;  %v626_v19 = vrot.slane %v624_v16, 1  ;;  %v1033_v24 = vld.sshfl [vmem:[%s1262_s9 + $0x2] sm:$0x3 pattern:$0x76325410] }
  0x1b   : >> { %1087 = vmatprep.subr.bf16.mxu1 %v1155_v2  ;;  %v446_v14 = vor.u32 %v445_v11, %v441_v9  ;;  %v806_v25 = vshll.u32 %v1033_v24, 16  ;;  %v1138_v27 = vld [vmem:[%s1346_s4 + $0x40] sm:$0xff]   ;;  %v804_v29 = vshrl.u32 %v1033_v24, 16 }
  0x1c   : >> { %v627_v20 = vor.u32 %v626_v19, %v622_v18 }
  0x1d   : >> { %v808_v30 = vrot.slane %v806_v25, 1 }
  0x1f   : >> { %1072 = vmatmul.mubr.msk.bf16.vlgmr.msra.gmra.mrb[4].mxu0 %vm335_vm1, %v446_v14  ;;  %v809_v31 = vor.u32 %v808_v30, %v804_v29 }
  0x20   : >> { %1082 = vmatpush3.bf16.msra.mxu0 %v1134_v12  ;;  %1078 = vmatmul.mubr.msk.bf16.vlgmr.msra.gmra.mrb[4].mxu1 %vm335_vm1, %v499_v15 }
  0x21   : >> { %1083 = vmatprep.mubr.msk.bf16.mxu0 %vm1156_vm0, %v1155_v2  ;;  %1088 = vmatpush3.bf16.msra.mxu1 %v1135_v17 }
  0x22   : >> { %1093 = vmatprep.subr.bf16.mxu0 %v1155_v2  ;;  %1089 = vmatprep.mubr.msk.bf16.mxu1 %vm1156_vm0, %v1155_v2 }
  0x23   : >> { %1099 = vmatprep.subr.bf16.mxu1 %v1155_v2 }
  0x27   : >> { %1084 = vmatmul.mubr.msk.bf16.vlgmr.msra.gmra.mrb[8].mxu0 %vm335_vm1, %v555_v21 }
  0x28   : >> { %1094 = vmatpush3.bf16.msra.mxu0 %v1136_v22  ;;  %1090 = vmatmul.mubr.msk.bf16.vlgmr.msra.gmra.mrb[8].mxu1 %vm335_vm1, %v627_v20 }
  0x29   : >> { %1095 = vmatprep.mubr.msk.bf16.mxu0 %vm1156_vm0, %v1155_v2  ;;  %1100 = vmatpush3.bf16.msra.mxu1 %v1137_v23 }
  0x2a   : >> { %1105 = vmatprep.subr.bf16.mxu0 %v1155_v2  ;;  %1101 = vmatprep.mubr.msk.bf16.mxu1 %vm1156_vm0, %v1155_v2 }
  0x2f   : >> { %1096 = vmatmul.mubr.msk.bf16.vlgmr.msra.gmra.mrb[12].mxu0 %vm335_vm1, %v1019_v26 }
  0x30   : >> { %1106 = vmatpush3.bf16.msra.mxu0 %v1138_v27  ;;  %1102 = vmatmul.mubr.msk.bf16.vlgmr.msra.gmra.mrb[12].mxu1 %vm335_vm1, %v1025_v28 }
  0x31   : >> { %1107 = vmatprep.mubr.msk.bf16.mxu0 %vm1156_vm0, %v1155_v2 }
  0x37   : >> { %1108 = vmatmul.mubr.msk.bf16.vlgmr.msra.gmra.mrb[16].mxu0 %vm335_vm1, %v809_v31 }
  0xea   : >> { %v373_v32 = vpop.f32.mrb[0].mxu0 }
  0xeb   : >> { %v1061_v33 = vpop.f32.mrb[1].mxu0  ;;  %v422_v34 = vpop.f32.mrb[0].mxu1 }
  0xec   : >> { %v423_v35 = vadd.f32 %v422_v34, %v373_v32  ;;  %v376_v36 = vpop.f32.mrb[2].mxu0  ;;  %v1067_v37 = vpop.f32.mrb[1].mxu1 }
  0xed   : >> { %v1062_v38 = vpop.f32.mrb[3].mxu0  ;;  %v425_v39 = vpop.f32.mrb[2].mxu1 }
  0xee   : >> { %v1068_v40 = vpop.f32.mrb[3].mxu1 }
  0xf2   : >> { %v490_v41 = vpop.f32.mrb[4].mxu0 }
  0xf3   : >> { %v496_v42 = vadd.f32 %v490_v41, %v423_v35  ;;  %v1073_v43 = vpop.f32.mrb[5].mxu0  ;;  %v546_v44 = vpop.f32.mrb[4].mxu1 }
  0xf4   : >> { %v493_v45 = vpop.f32.mrb[6].mxu0  ;;  %v1079_v46 = vpop.f32.mrb[5].mxu1 }
  0xf5   : >> { %v552_v47 = vadd.f32 %v546_v44, %v496_v42  ;;  %v1074_v48 = vpop.f32.mrb[7].mxu0  ;;  %v549_v49 = vpop.f32.mrb[6].mxu1 }
  0xf6   : >> { %v1080_v50 = vpop.f32.mrb[7].mxu1 }
  0xfa   : >> { %v602_v51 = vpop.f32.mrb[8].mxu0 }
  0xfb   : >> { %v608_v52 = vadd.f32 %v602_v51, %v552_v47  ;;  %v1085_v53 = vpop.f32.mrb[9].mxu0  ;;  %v671_v54 = vpop.f32.mrb[8].mxu1 }
  0xfc   : >> { %v605_v55 = vpop.f32.mrb[10].mxu0  ;;  %v1091_v56 = vpop.f32.mrb[9].mxu1 }
  0xfd   : >> { %v677_v57 = vadd.f32 %v671_v54, %v608_v52  ;;  %v1086_v58 = vpop.f32.mrb[11].mxu0  ;;  %v674_v59 = vpop.f32.mrb[10].mxu1 }
  0xfe   : >> { %v1092_v60 = vpop.f32.mrb[11].mxu1 }
 0x102   : >> { %v728_v61 = vpop.f32.mrb[12].mxu0 }
 0x103   : >> { %v734_v62 = vadd.f32 %v728_v61, %v677_v57  ;;  %v1097_v63 = vpop.f32.mrb[13].mxu0  ;;  %v784_v1 = vpop.f32.mrb[12].mxu1 }
 0x104   : >> { %v731_v2 = vpop.f32.mrb[14].mxu0  ;;  %v1103_v3 = vpop.f32.mrb[13].mxu1 }
 0x105   : >> { %v790_v4 = vadd.f32 %v784_v1, %v734_v62  ;;  %v1098_v5 = vpop.f32.mrb[15].mxu0  ;;  %v787_v6 = vpop.f32.mrb[14].mxu1 }
 0x106   : >> { %v1104_v7 = vpop.f32.mrb[15].mxu1 }
 0x10a   : >> { %v853_v8 = vpop.f32.mrb[16].mxu0 }
 0x10b   : >> { %v859_v9 = vadd.f32 %v853_v8, %v790_v4  ;;  %v1109_v10 = vpop.f32.mrb[17].mxu0  ;;  %316 = sbr.rel (!%p314_p4) target bundleno = 18 (0x12), region = 105 }
 0x10c   : >> { %v856_v11 = vpop.f32.mrb[18].mxu0 }
 0x10d   : >> { %v866_v12 = vadd.f32 %v1203_v0, %v859_v9  ;;  %v1110_v13 = vpop.f32.mrb[19].mxu0 }
 0x10f   : >> { %v867_v14 = vpack.c.bf16 %v866_v12, %v866_v12 }
 0x111   : >> { %870 = vst.msk [vmem:[%s868_s28] sm:$0x1] %vm869_vm2, %v867_v14 }
 0x112 PF: > { %s16_s21 = sadd.s32 1, %s1149_s21  }
 0x113   : > { %p13_p5 = scmp.ge.s32.totalorder %s16_s21, 4  }
 0x115   :  { %15 = sbr.rel (!%p13_p5) target bundleno = 1 (0x1), region = 116 }

// kernel: monet_forward.7
= control target key start
LH: loop header
LB: loop body
LE: loop exit
PB: predicated region body
PF: predicated region fallthrough
CT: control target
= control target key end

     0   :  { %s1151_s21 = smov 0   ;;  %s1276_s0 = inlined_call_operand.vmem [shape: bf16[2,8,32], index: 0, kind: input, shape index: {}]   ;;  %s1277_s1 = inlined_call_operand.vmem [shape: f32[1,32], index: 1, kind: input, shape index: {}]   ;;  %s1278_s2 = inlined_call_operand.vmem [shape: f32[1,32], index: 2, kind: input, shape index: {}, may-alias: {2,7,11}]   ;;  %s1279_s3 = inlined_call_operand.vmem [shape: bf16[32,16], index: 3, kind: input, shape index: {}]   ;;  %s1280_s4 = inlined_call_operand.vmem [shape: bf16[32,16], index: 4, kind: input, shape index: {}]   ;;  %s1281_s5 = inlined_call_operand.vmem [shape: bf16[8,8], index: 5, kind: input, shape index: {}]   ;;  %s1282_s6 = inlined_call_operand.vmem [shape: bf16[16,32], index: 6, kind: input, shape index: {}]   ;;  %s1283_s7 = inlined_call_operand.vmem [shape: f32[1,32], index: 7, kind: input, shape index: {}, may-alias: {2,7,11}]   ;;  %s1284_s8 = inlined_call_operand.vmem [shape: bf16[32,48], index: 8, kind: input, shape index: {}]   ;;  %s1285_s9 = inlined_call_operand.vmem [shape: bf16[32,48], index: 9, kind: input, shape index: {}]   ;;  %s1286_s10 = inlined_call_operand.vmem [shape: bf16[48,32], index: 10, kind: input, shape index: {}]   ;;  %s1287_s11 = inlined_call_operand.vmem [shape: f32[1,32], index: 11, kind: input, shape index: {}, may-alias: {2,7,11}]   ;;  %s1288_s12 = inlined_call_operand.vmem [shape: bf16[2,8,32], index: 12, kind: output, shape index: {}]  }
   0x1 LB: > { %s944_s22 = sadd.s32 4294967295, %s1082_s21   ;;  %p948_p0 = scmp.ge.s32.totalorder %s1082_s21, 1  ;;  %s1082_s21 = sphi %s1151_s21, %s22_s21  }
   0x2   : > { %p361_p1 = scmp.lt.s32.totalorder %s1082_s21, 3 }
   0x4   : > { %p362_p2 = pnand %p948_p0, %p361_p1 }
   0x5   : > { %p401_p3 = scmp.lt.s32.totalorder (!%p362_p2), %s944_s22, 1  ;;  %vm428_vm0 = vcmask (!%p362_p2), 261120   ;;  %v1060_v5 = vld [vmem:[%s1279_s3] sm:$0xff] (!%p362_p2)   ;;  %v1084_v6 = vmov (!%p362_p2), 0.0   ;;  %vm1085_vm1 = vmmov (!%p362_p2), 0   ;;  %v1061_v7 = vld [vmem:[%s1279_s3 + $0x8] sm:$0xff] (!%p362_p2)  }
   0x6   : > { %365 = sbr.rel (%p362_p2) target bundleno = 1460 (0x5b4), region = 68  ;;  %996 = vmatprep.subr.bf16.mxu1 (!%p362_p2), %v1084_v6  ;;  %1000 = vmatprep.mubr.msk.bf16.mxu1 (!%p362_p2), %vm1085_vm1, %v1084_v6  ;;  %v1192_v18 = vld [vmem:[%s1277_s1] ss:$0 sm:$0xff] (!%p362_p2)  ;;  %v1063_v25 = vld [vmem:[%s1280_s4 + $0x8] sm:$0xff] (!%p362_p2)   ;;  %vm570_vm2 = vcmask (!%p362_p2), 1043456   ;;  %vm566_vm3 = vcmask (!%p362_p2), 64512  }
   0x7   : > { %997 = vmatpush3.bf16.msra.mxu1 (!%p362_p2), %v1060_v5  ;;  %1012 = vmatprep.subr.bf16.mxu0 (!%p362_p2), %v1084_v6  ;;  %v1197_v20 = vld [vmem:[%s1278_s2] ss:$0 sm:$0xff] (!%p362_p2)  ;;  %vm624_vm4 = vcmask (!%p362_p2), 130048   ;;  %v1067_v56 = vld [vmem:[%s1284_s8 + $0x8] sm:$0xff] (!%p362_p2)   ;;  %vm836_vm5 = vcmask (!%p362_p2), 392192   ;;  %vm889_vm6 = vcmask (!%p362_p2), 257024  }
   0x8   : > { %998 = vmatprep.subr.bf16.mxu1 (!%p362_p2), %v1084_v6  ;;  %1014 = vmatprep.mubr.msk.bf16.mxu0 (!%p362_p2), %vm1085_vm1, %v1084_v6  ;;  %v1062_v23 = vld [vmem:[%s1280_s4] sm:$0xff] (!%p362_p2)   ;;  %v1068_v57 = vld [vmem:[%s1285_s9 + $0x8] sm:$0xff] (!%p362_p2)  }
   0x9   : > { %v1064_v26 = vld [vmem:[%s1282_s6] sm:$0xff] (!%p362_p2)  }
   0xa   : > { %v564_v37 = vld [vmem:[%s1281_s5] sm:$0xf] (!%p362_p2) }
   0xb   : > { %999 = vmatpush3.bf16.msra.mxu1 (!%p362_p2), %v1061_v7  ;;  %v962_v44 = vld [vmem:[%s1283_s7] ss:$0 sm:$0xff] (!%p362_p2) }
   0xc   : > { %1004 = vmatprep.subr.bf16.mxu1 (!%p362_p2), %v1084_v6  ;;  %v1065_v54 = vld [vmem:[%s1284_s8] sm:$0xff] (!%p362_p2)  }
   0xd   : > { %s1290_s22 = smov (!%p401_p3, %s944_s22), 1  ;;  %v1066_v55 = vld [vmem:[%s1285_s9] sm:$0xff]  }
   0xe   : > { %s949_s23 = sshll.u32 %s1290_s22, 2 }
   0xf   : > { %s404_s26 = scalar_lea.vmem %s1276_s0, %s949_s23  ;;  %s408_s15 = scalar_lea.vmem %s1288_s12, %s949_s23 }
  0x10   : > { %v410_v0 = vld [vmem:[%s404_s26] sm:$0xf] }
  0x11   : > { %v1167_v1 = vunpack.c.l.bf16 %v410_v0 }
  0x13   : > { %v429_v2 = vsel %vm428_vm0, %v1167_v1, 0.0  ;;  %v434_v3 = vmul.f32 %v1167_v1, %v1167_v1 }
  0x14   : > { %430 = vadd.xlane.f32.xlu0 %v429_v2 }
  0x15   : > { %v435_v4 = vsel %vm428_vm0, %v434_v3, 0.0 }
  0x18   : > { %436 = vadd.xlane.f32.xlu0 %v435_v4 }
  0xa1   : > { %v431_v8 = vpop.xlane.xlu0 %430 }
  0xa2   : > { %v433_v9 = vmul.f32 0.03125, %v431_v8  ;;  %v1069_v8 = vld [vmem:[%s1286_s10] sm:$0xff]  }
  0xa4   : > { %v439_v11 = vmul.f32 %v433_v9, %v433_v9  ;;  %v442_v16 = vsub.f32 %v1167_v1, %v433_v9 }
  0xa5   : > { %v437_v10 = vpop.xlane.xlu0 %436 }
  0xa6   : > { %v438_v12 = vmul.f32 0.03125, %v437_v10  ;;  %v1070_v10 = vld [vmem:[%s1286_s10 + $0x8] sm:$0xff]  }
  0xa8   : > { %v440_v13 = vsub.f32 %v438_v12, %v439_v11  ;;  %v1071_v11 = vld [vmem:[%s1286_s10 + $0x10] sm:$0xff]  }
  0xaa   : > { %v441_v14 = vmax.f32 %v440_v13, 0.0 }
  0xac   : > { %v443_v15 = vadd.f32 1e-06, %v441_v14 }
  0xae   : > { %1072 = vrsqrt.f32 %v443_v15 }
  0xb8   : > { %v1073_v17 = vpop.eup %1072 }
  0xb9   : > { %v445_v19 = vmul.f32 %v1073_v17, %v442_v16 }
  0xbb   : > { %v446_v21 = vmul.f32 %v1192_v18, %v445_v19 }
  0xbd   : > { %v447_v22 = vadd.f32 %v1197_v20, %v446_v21 }
  0xbf   : > { %v448_v24 = vpack.c.bf16 %v447_v22, %v447_v22 }
  0xc1   : > { %1001 = vmatmul.mubr.msk.bf16.vlgmr.msra.gmra.mrb[0].mxu1 %vm428_vm0, %v448_v24 }
  0xc2   : > { %1005 = vmatpush3.bf16.msra.mxu1 %v1062_v23  ;;  %1008 = vmatprep.mubr.msk.bf16.mxu1 %vm1085_vm1, %v1084_v6 }
  0xc3   : > { %1006 = vmatprep.subr.bf16.mxu1 %v1084_v6 }
  0xc6   : > { %1007 = vmatpush3.bf16.msra.mxu1 %v1063_v25 }
  0xc7   : > { %1018 = vmatprep.subr.bf16.mxu1 %v1084_v6 }
  0xc9   : > { %1009 = vmatmul.mubr.msk.bf16.vlgmr.msra.gmra.mrb[4].mxu1 %vm428_vm0, %v448_v24 }
  0xca   : > { %1020 = vmatprep.mubr.msk.bf16.mxu1 %vm1085_vm1, %v1084_v6  ;;  %1019 = vmatpush3.bf16.msra.mxu1 %v1064_v26 }
  0xcb   : > { %1032 = vmatprep.subr.bf16.mxu1 %v1084_v6 }
 0x194   : > { %v502_v27 = vpop.f32.mrb[0].mxu1 }
 0x195   : > { %v1002_v28 = vpop.f32.mrb[1].mxu1 }
 0x196   : > { %v505_v29 = vpop.f32.mrb[2].mxu1 }
 0x197   : > { %v1003_v30 = vpop.f32.mrb[3].mxu1 }
 0x19c   : > { %v558_v31 = vpop.f32.mrb[4].mxu1 }
 0x19d   : > { %v565_v32 = vpack.c.bf16 %v558_v31, %v558_v31  ;;  %v1010_v33 = vpop.f32.mrb[5].mxu1 }
 0x19e   : > { %v561_v34 = vpop.f32.mrb[6].mxu1 }
 0x19f   : > { %v1011_v35 = vpop.f32.mrb[7].mxu1  ;;  %v572_v36 = vsel %vm570_vm2, %v565_v32, 0 }
 0x1a0   : > { %1013 = vmatpush3.bf16.msra.mxu0 %v572_v36 }
 0x1a1   : > { %1024 = vmatprep.subr.bf16.mxu0 %v1084_v6 }
 0x1a3   : > { %1015 = vmatmul.mubr.msk.bf16.vlgmr.msra.gmra.mrb[0].mxu0 %vm566_vm3, %v564_v37 }
 0x1a4   : > { %1028 = vmatprep.mubr.msk.bf16.mxu0 %vm1085_vm1, %v1084_v6  ;;  %1025 = vmatpush3.bf16.msra.mxu0 %v1065_v54 }
 0x1a5   : > { %1026 = vmatprep.subr.bf16.mxu0 %v1084_v6 }
 0x1a8   : > { %1027 = vmatpush3.bf16.msra.mxu0 %v1067_v56 }
 0x1a9   : > { %1040 = vmatprep.subr.bf16.mxu0 %v1084_v6 }
 0x276   : > { %v608_v38 = vpop.f32.mrb[0].mxu0 }
 0x277   : > { %v614_v39 = vmul.f32 %v608_v38, %v502_v27  ;;  %v1016_v40 = vpop.f32.mrb[1].mxu0 }
 0x278   : > { %v611_v41 = vpop.f32.mrb[2].mxu0 }
 0x279   : > { %v615_v42 = vpack.c.bf16 %v614_v39, %v614_v39  ;;  %v1017_v43 = vpop.f32.mrb[3].mxu0 }
 0x27b   : > { %1021 = vmatmul.mubr.msk.bf16.vlgmr.msra.gmra.mrb[8].mxu1 %vm624_vm4, %v615_v42 }
 0x27c   : > { %1036 = vmatprep.mubr.msk.bf16.mxu1 %vm1085_vm1, %v1084_v6  ;;  %1033 = vmatpush3.bf16.msra.mxu1 %v1066_v55 }
 0x27d   : > { %1034 = vmatprep.subr.bf16.mxu1 %v1084_v6 }
 0x280   : > { %1035 = vmatpush3.bf16.msra.mxu1 %v1068_v57 }
 0x34e   : > { %v662_v45 = vpop.f32.mrb[8].mxu1 }
 0x34f   : > { %v668_v46 = vadd.f32 %v662_v45, %v1167_v1  ;;  %v1022_v47 = vpop.f32.mrb[9].mxu1 }
 0x350   : > { %v665_v48 = vpop.f32.mrb[10].mxu1 }
 0x351   : > { %v675_v49 = vadd.f32 %v962_v44, %v668_v46  ;;  %v1023_v50 = vpop.f32.mrb[11].mxu1 }
 0x353   : > { %v676_v51 = vsel %vm428_vm0, %v675_v49, 0.0  ;;  %v680_v52 = vmul.f32 %v675_v49, %v675_v49 }
 0x354   : > { %677 = vadd.xlane.f32.xlu1 %v676_v51 }
 0x355   : > { %v681_v53 = vsel %vm428_vm0, %v680_v52, 0.0 }
 0x358   : > { %682 = vadd.xlane.f32.xlu1 %v681_v53 }
 0x3e1   : > { %v678_v58 = vpop.xlane.xlu1 %677 }
 0x3e2   : > { %v679_v59 = vmul.f32 0.03125, %v678_v58 }
 0x3e4   : > { %v685_v61 = vmul.f32 %v679_v59, %v679_v59  ;;  %v688_v2 = vsub.f32 %v675_v49, %v679_v59 }
 0x3e5   : > { %v683_v60 = vpop.xlane.xlu1 %682 }
 0x3e6   : > { %v684_v62 = vmul.f32 0.03125, %v683_v60 }
 0x3e8   : > { %v686_v63 = vsub.f32 %v684_v62, %v685_v61 }
 0x3ea   : > { %v687_v0 = vmax.f32 %v686_v63, 0.0 }
 0x3ec   : > { %v689_v1 = vadd.f32 1e-06, %v687_v0 }
 0x3ee   : > { %1074 = vrsqrt.f32 %v689_v1 }
 0x3f8   : > { %v1075_v3 = vpop.eup %1074 }
 0x3f9   : > { %v691_v4 = vmul.f32 %v1075_v3, %v688_v2 }
 0x3fb   : > { %v692_v5 = vmul.f32 %v1192_v18, %v691_v4 }
 0x3fd   : > { %v693_v7 = vadd.f32 %v1197_v20, %v692_v5 }
 0x3ff   : > { %v694_v9 = vpack.c.bf16 %v693_v7, %v693_v7 }
 0x401   : > { %1029 = vmatmul.mubr.msk.bf16.vlgmr.msra.gmra.mrb[4].mxu0 %vm428_vm0, %v694_v9  ;;  %1037 = vmatmul.mubr.msk.bf16.vlgmr.msra.gmra.mrb[12].mxu1 %vm428_vm0, %v694_v9 }
 0x402   : > { %1041 = vmatpush3.bf16.msra.mxu0 %v1069_v8  ;;  %1046 = vmatprep.mubr.msk.bf16.mxu0 %vm1085_vm1, %v1084_v6 }
 0x403   : > { %1042 = vmatprep.subr.bf16.mxu0 %v1084_v6 }
 0x406   : > { %1043 = vmatpush3.bf16.msra.mxu0 %v1070_v10 }
 0x407   : > { %1044 = vmatprep.subr.bf16.mxu0 %v1084_v6  ;;  %v973_v6 = vld [vmem:[%s1287_s11] ss:$0 sm:$0xff] }
 0x40a   : > { %1045 = vmatpush3.bf16.msra.mxu0 %v1071_v11 }
 0x4d4   : > { %v748_v12 = vpop.f32.mrb[4].mxu0  ;;  %v804_v13 = vpop.f32.mrb[12].mxu1 }
 0x4d5   : > { %v810_v14 = vmul.f32 %v804_v13, %v748_v12  ;;  %v1030_v15 = vpop.f32.mrb[5].mxu0  ;;  %v1038_v16 = vpop.f32.mrb[13].mxu1 }
 0x4d6   : > { %v751_v17 = vpop.f32.mrb[6].mxu0  ;;  %v807_v18 = vpop.f32.mrb[14].mxu1 }
 0x4d7   : > { %v811_v19 = vpack.c.bf16 %v810_v14, %v810_v14  ;;  %v1031_v20 = vpop.f32.mrb[7].mxu0  ;;  %v1039_v21 = vpop.f32.mrb[15].mxu1 }
 0x4d9   : > { %1047 = vmatmul.mubr.msk.bf16.vlgmr.msra.gmra.mrb[8].mxu0 %vm836_vm5, %v811_v19 }
 0x5ac   : > { %v874_v22 = vpop.f32.mrb[8].mxu0 }
 0x5ad   : > { %v880_v23 = vadd.f32 %v874_v22, %v675_v49  ;;  %v1048_v24 = vpop.f32.mrb[9].mxu0 }
 0x5ae   : > { %v877_v25 = vpop.f32.mrb[10].mxu0 }
 0x5af   : > { %v887_v26 = vadd.f32 %v973_v6, %v880_v23  ;;  %v1049_v27 = vpop.f32.mrb[11].mxu0 }
 0x5b1   : > { %v888_v28 = vpack.c.bf16 %v887_v26, %v887_v26 }
 0x5b3   : > { %890 = vst.msk [vmem:[%s408_s15] sm:$0xf] %vm889_vm6, %v888_v28 }
 0x5b4 PF: > { %s22_s21 = sadd.s32 1, %s1082_s21  }
 0x5b5   : > { %p19_p4 = scmp.ge.s32.totalorder %s22_s21, 4  }
 0x5b7   :  { %21 = sbr.rel (!%p19_p4) target bundleno = 1 (0x1), region = 98 }

</bundles_post_ra>
